<compile_context>
chip_gen: v5e
topology: v5e:2x2
jax: 0.10.0
libtpu: 0.0.40
codegen_flags: <defaults>
</compile_context>

<pallas_src>
import functools

import numpy as np
import jax
import jax.numpy as jnp
from jax.experimental import pallas as pl
from jax.experimental.pallas import tpu as pltpu


def innerpnn_kernel(flat_ref, sel_ref, ssum_ref,
                    w1a_ref, w1c_ref, b1_ref,
                    w2_ref, b2_ref, w3_ref, b3_ref,
                    w4_ref, b4_ref, out_ref, *, kc):
    x = flat_ref[...]                                                  # (TB, DFP) bf16

    # ---- fused field-selection matmul: one MXU pass, lane-aligned slices ----
    both = jnp.dot(x, sel_ref[...], preferred_element_type=jnp.float32)  # (TB, 2*KC)
    er = both[:, :kc]                                                  # (TB, KC)
    ec = both[:, kc:]                                                  # (TB, KC)
    prod = er * ec        # f32 VPU; exact products of bf16-rounded embedding values

    # ---- collapse each L-lane group -> pairwise inner products (TB, PP) ----
    ip = jnp.dot(prod.astype(jnp.bfloat16), ssum_ref[...],
                 preferred_element_type=jnp.float32)

    # ---- layer 1: flat part + (un-replicated) cross part ----
    h = jnp.dot(x, w1a_ref[...], preferred_element_type=jnp.float32)
    h = h + jnp.dot(ip.astype(jnp.bfloat16), w1c_ref[...],
                    preferred_element_type=jnp.float32)
    h = jnp.maximum(h + b1_ref[...], 0.0)
    # TODO(synk): nn.Dropout(p=0.2) -> identity (eval-mode semantics).

    # ---- layers 2-3 (bf16 operands, f32 accumulate, f32 bias/ReLU) ----
    h = jnp.maximum(
        jnp.dot(h.astype(jnp.bfloat16), w2_ref[...],
                preferred_element_type=jnp.float32) + b2_ref[...], 0.0)
    h = jnp.maximum(
        jnp.dot(h.astype(jnp.bfloat16), w3_ref[...],
                preferred_element_type=jnp.float32) + b3_ref[...], 0.0)

    # ---- final 300 -> 1: VPU broadcast-multiply + XLU row-reduce (no transpose,
    #      no N=1 MXU drain).  Padded hidden columns are exactly zero. ----
    logit = jnp.sum(h * w4_ref[...], axis=-1, keepdims=True) + b4_ref[...]  # (TB, 1)
    out_ref[...] = jax.nn.sigmoid(logit)


def _round_up(n, m):
    return ((n + m - 1) // m) * m


def _pad2(a, r, c):
    return jnp.pad(a, ((0, r - a.shape[0]), (0, c - a.shape[1])))


def _field_pairs(F):
    rows, cols = [], []
    for i in range(F - 1):
        for j in range(i + 1, F):
            rows.append(i)
            cols.append(j)
    return rows, cols


def innerpnn_forward(x, emb_table, mlp_params, *, tile_b=512):
    """x: (B, F) int32 indices.  Returns (B, 1) f32 pctrs."""
    B, F = x.shape
    L = emb_table.shape[1]
    DF = F * L
    rows, cols = _field_pairs(F)
    P = len(rows)

    H = mlp_params[0][0].shape[1]        # 300
    HP = _round_up(H, 128)               # 384
    DFP = _round_up(DF, 128)             # 128 for F=8, L=16
    KC = _round_up(P * L, 128)           # 512 for P=28, L=16
    PP = _round_up(P, 128)               # 128 for P=28

    # ---- batch tiling: big lane-dense tiles; >=2 tiles for v7x dual-TC ----
    if B <= 256:
        TB = _round_up(B, 8)
    else:
        half = _round_up((B + 1) // 2, 128)          # at least two grid steps
        TB = min(_round_up(tile_b, 128), half)
    B_pad = _round_up(B, TB)
    num_tiles = B_pad // TB

    # ---- glue: embedding gather + flatten -> single lane-dense bf16 stream ----
    flat = emb_table[x].reshape(B, DF).astype(jnp.bfloat16)
    flat = jnp.pad(flat, ((0, B_pad - B), (0, DFP - DF)))

    # ---- constant 0/1 matrices (exact in bf16, VMEM-resident across grid) ----
    srow = np.zeros((DFP, KC), np.float32)
    scol = np.zeros((DFP, KC), np.float32)
    ssum = np.zeros((KC, PP), np.float32)
    for p in range(P):
        for l in range(L):
            srow[rows[p] * L + l, p * L + l] = 1.0
            scol[cols[p] * L + l, p * L + l] = 1.0
            ssum[p * L + l, p] = 1.0
    sel = jnp.asarray(np.concatenate([srow, scol], axis=1), dtype=jnp.bfloat16)
    ssum = jnp.asarray(ssum, dtype=jnp.bfloat16)

    # ---- weight prep: split / zero-pad (exact) / cast matmul weights to bf16 ----
    (w1, b1), (w2, b2), (w3, b3), (w4, b4) = mlp_params
    w1a = _pad2(w1[:DF, :].astype(jnp.float32), DFP, HP).astype(jnp.bfloat16)
    w1c = _pad2(w1[DF:, :].astype(jnp.float32), PP, HP).astype(jnp.bfloat16)
    b1p = _pad2(b1.astype(jnp.float32).reshape(1, -1), 1, HP)
    w2p = _pad2(w2.astype(jnp.float32), HP, HP).astype(jnp.bfloat16)
    b2p = _pad2(b2.astype(jnp.float32).reshape(1, -1), 1, HP)
    w3p = _pad2(w3.astype(jnp.float32), HP, HP).astype(jnp.bfloat16)
    b3p = _pad2(b3.astype(jnp.float32).reshape(1, -1), 1, HP)
    w4r = _pad2(w4.astype(jnp.float32).T, 1, HP)                      # (1, HP) f32
    b4p = b4.astype(jnp.float32).reshape(1, 1)

    def resident(shape):
        return pl.BlockSpec(shape, lambda i: (0, 0))

    flops = 2 * B_pad * (DFP * 2 * KC + KC * PP + PP * HP + DFP * HP
                         + 2 * HP * HP + HP)
    bytes_accessed = (2 * (B_pad * DFP + DFP * 2 * KC + KC * PP
                           + DFP * HP + PP * HP + 2 * HP * HP)
                      + 4 * (4 * HP + 1 + B_pad))

    out = pl.pallas_call(
        functools.partial(innerpnn_kernel, kc=KC),
        out_shape=jax.ShapeDtypeStruct((B_pad, 1), jnp.float32),
        grid=(num_tiles,),
        in_specs=[
            pl.BlockSpec((TB, DFP), lambda i: (i, 0)),   # activations (batch-tiled)
            resident((DFP, 2 * KC)),                      # fused srow|scol
            resident((KC, PP)),                           # pair-sum matrix
            resident((DFP, HP)),                          # w1 (flat part)
            resident((PP, HP)),                           # w1 (cross part)
            resident((1, HP)),                            # b1
            resident((HP, HP)),                           # w2
            resident((1, HP)),                            # b2
            resident((HP, HP)),                           # w3
            resident((1, HP)),                            # b3
            resident((1, HP)),                            # w4 (as a row, f32)
            resident((1, 1)),                             # b4
        ],
        out_specs=pl.BlockSpec((TB, 1), lambda i: (i, 0)),
        compiler_params=pltpu.CompilerParams(
            dimension_semantics=("parallel",),
            vmem_limit_bytes=32 * 1024 * 1024),
        cost_estimate=pl.CostEstimate(
            flops=flops, transcendentals=B_pad, bytes_accessed=bytes_accessed),
    )(flat, sel, ssum, w1a, w1c, b1p, w2p, b2p, w3p, b3p, w4r, b4p)

    return out[:B]


def init_params(key, feature_nums, field_nums, latent_dims):
    ks = jax.random.split(key, 6)

    # xavier_uniform_ on feature_embedding.weight
    a = float(np.sqrt(6.0 / (feature_nums + latent_dims)))
    emb_table = jax.random.uniform(ks[0], (feature_nums, latent_dims),
                                   jnp.float32, -a, a)

    P = field_nums * (field_nums - 1) // 2
    deep_in = field_nums * latent_dims + P
    dims = [deep_in, 300, 300, 300, 1]

    # weight_init on Linear layers: W ~ U(-1/sqrt(in), 1/sqrt(in)), b = 0.
    def linear_init(k, fan_in, fan_out):
        y = float(1.0 / np.sqrt(fan_in))
        w = jax.random.uniform(k, (fan_in, fan_out), jnp.float32, -y, y)
        b = jnp.zeros((1, fan_out), jnp.float32)
        return w, b

    mlp_params = tuple(linear_init(ks[1 + i], dims[i], dims[i + 1]) for i in range(4))
    return emb_table, mlp_params


def reference_forward(x, emb_table, mlp_params):
    """Pure-JAX f32 reference mirroring the PyTorch InnerPNN forward (eval mode)."""
    B, F = x.shape
    L = emb_table.shape[1]
    rows, cols = _field_pairs(F)
    emb = emb_table[x]                                                    # (B, F, L)
    ip = jnp.sum(emb[:, jnp.asarray(rows), :] * emb[:, jnp.asarray(cols), :], axis=2)
    h = jnp.concatenate([emb.reshape(B, F * L), ip], axis=1)
    n = len(mlp_params)
    for i, (w, b) in enumerate(mlp_params):
        h = h @ w + b
        if i < n - 1:
            h = jnp.maximum(h, 0.0)
    return jax.nn.sigmoid(h)


if __name__ == "__main__":
    feature_nums = 100
    field_nums = 8
    latent_dims = 16
    batch = 8

    key = jax.random.PRNGKey(0)
    k_params, k_x = jax.random.split(key)

    emb_table, mlp_params = init_params(k_params, feature_nums, field_nums, latent_dims)
    x = jax.random.randint(k_x, (batch, field_nums), 0, feature_nums, dtype=jnp.int32)

    out = innerpnn_forward(x, emb_table, mlp_params)
    out = jax.block_until_ready(out)

    ref = reference_forward(x, emb_table, mlp_params)
    # bf16 MXU operands with f32 accumulation -> slightly looser tolerance than f32.
    np.testing.assert_allclose(np.asarray(out), np.asarray(ref), rtol=2e-2, atol=2e-2)

    print("KERNEL_OK")
</pallas_src>

<mosaic_0001>
module attributes {stable_mosaic.version = 11 : i64} {
  func.func @innerpnn_kernel(%arg0: i32, %arg1: memref<8x128xbf16, #tpu.memory_space<vmem>>, %arg2: memref<128x1024xbf16, #tpu.memory_space<vmem>>, %arg3: memref<512x128xbf16, #tpu.memory_space<vmem>>, %arg4: memref<128x384xbf16, #tpu.memory_space<vmem>>, %arg5: memref<128x384xbf16, #tpu.memory_space<vmem>>, %arg6: memref<1x384xf32, #tpu.memory_space<vmem>>, %arg7: memref<384x384xbf16, #tpu.memory_space<vmem>>, %arg8: memref<1x384xf32, #tpu.memory_space<vmem>>, %arg9: memref<384x384xbf16, #tpu.memory_space<vmem>>, %arg10: memref<1x384xf32, #tpu.memory_space<vmem>>, %arg11: memref<1x384xf32, #tpu.memory_space<vmem>>, %arg12: memref<1x1xf32, #tpu.memory_space<vmem>>, %arg13: memref<8x1xf32, #tpu.memory_space<vmem>>) attributes {dimension_semantics = [#tpu.dimension_semantics<parallel>], iteration_bounds = array<i64: 1>, scalar_prefetch = 0 : i64, scratch_operands = 0 : i64, tpu.core_type = #tpu.core_type<tc>, window_params = [{transform_indices = @transform_0, window_bounds = array<i64: 8, 128>}, {pipeline_mode = #tpu.pipeline_mode<synchronous>, transform_indices = @transform_1, window_bounds = array<i64: 128, 1024>}, {pipeline_mode = #tpu.pipeline_mode<synchronous>, transform_indices = @transform_2, window_bounds = array<i64: 512, 128>}, {pipeline_mode = #tpu.pipeline_mode<synchronous>, transform_indices = @transform_3, window_bounds = array<i64: 128, 384>}, {pipeline_mode = #tpu.pipeline_mode<synchronous>, transform_indices = @transform_4, window_bounds = array<i64: 128, 384>}, {pipeline_mode = #tpu.pipeline_mode<synchronous>, transform_indices = @transform_5, window_bounds = array<i64: 1, 384>}, {pipeline_mode = #tpu.pipeline_mode<synchronous>, transform_indices = @transform_6, window_bounds = array<i64: 384, 384>}, {pipeline_mode = #tpu.pipeline_mode<synchronous>, transform_indices = @transform_7, window_bounds = array<i64: 1, 384>}, {pipeline_mode = #tpu.pipeline_mode<synchronous>, transform_indices = @transform_8, window_bounds = array<i64: 384, 384>}, {pipeline_mode = #tpu.pipeline_mode<synchronous>, transform_indices = @transform_9, window_bounds = array<i64: 1, 384>}, {pipeline_mode = #tpu.pipeline_mode<synchronous>, transform_indices = @transform_10, window_bounds = array<i64: 1, 384>}, {pipeline_mode = #tpu.pipeline_mode<synchronous>, transform_indices = @transform_11, window_bounds = array<i64: 1, 1>}, {transform_indices = @transform_12, window_bounds = array<i64: 8, 1>}]} {
    %c0 = arith.constant 0 : index
    %c0_0 = arith.constant 0 : index
    %0 = vector.load %arg1[%c0, %c0_0] : memref<8x128xbf16, #tpu.memory_space<vmem>>, vector<8x128xbf16>
    %c0_1 = arith.constant 0 : index
    %c0_2 = arith.constant 0 : index
    %1 = vector.load %arg2[%c0_1, %c0_2] : memref<128x1024xbf16, #tpu.memory_space<vmem>>, vector<128x1024xbf16>
    %cst = arith.constant dense<0.000000e+00> : vector<8x1024xf32>
    %2 = tpu.matmul %0, %1, %cst {dimension_numbers = #tpu.dot_dimension_numbers<[1], [0], [0], [1], [0, 0, 1, 1], [], []>} : vector<8x128xbf16>, vector<128x1024xbf16>, vector<8x1024xf32> -> vector<8x1024xf32>
    %3 = vector.extract_strided_slice %2 {offsets = [0, 0], sizes = [8, 512], strides = [1, 1]} : vector<8x1024xf32> to vector<8x512xf32>
    %4 = vector.extract_strided_slice %2 {offsets = [0, 512], sizes = [8, 512], strides = [1, 1]} : vector<8x1024xf32> to vector<8x512xf32>
    %5 = arith.mulf %3, %4 : vector<8x512xf32>
    %6 = arith.truncf %5 : vector<8x512xf32> to vector<8x512xbf16>
    %c0_3 = arith.constant 0 : index
    %c0_4 = arith.constant 0 : index
    %7 = vector.load %arg3[%c0_3, %c0_4] : memref<512x128xbf16, #tpu.memory_space<vmem>>, vector<512x128xbf16>
    %cst_5 = arith.constant dense<0.000000e+00> : vector<8x128xf32>
    %8 = tpu.matmul %6, %7, %cst_5 {dimension_numbers = #tpu.dot_dimension_numbers<[1], [0], [0], [1], [0, 0, 1, 1], [], []>} : vector<8x512xbf16>, vector<512x128xbf16>, vector<8x128xf32> -> vector<8x128xf32>
    %c0_6 = arith.constant 0 : index
    %c0_7 = arith.constant 0 : index
    %9 = vector.load %arg4[%c0_6, %c0_7] : memref<128x384xbf16, #tpu.memory_space<vmem>>, vector<128x384xbf16>
    %cst_8 = arith.constant dense<0.000000e+00> : vector<8x384xf32>
    %10 = tpu.matmul %0, %9, %cst_8 {dimension_numbers = #tpu.dot_dimension_numbers<[1], [0], [0], [1], [0, 0, 1, 1], [], []>} : vector<8x128xbf16>, vector<128x384xbf16>, vector<8x384xf32> -> vector<8x384xf32>
    %11 = arith.truncf %8 : vector<8x128xf32> to vector<8x128xbf16>
    %c0_9 = arith.constant 0 : index
    %c0_10 = arith.constant 0 : index
    %12 = vector.load %arg5[%c0_9, %c0_10] : memref<128x384xbf16, #tpu.memory_space<vmem>>, vector<128x384xbf16>
    %cst_11 = arith.constant dense<0.000000e+00> : vector<8x384xf32>
    %13 = tpu.matmul %11, %12, %cst_11 {dimension_numbers = #tpu.dot_dimension_numbers<[1], [0], [0], [1], [0, 0, 1, 1], [], []>} : vector<8x128xbf16>, vector<128x384xbf16>, vector<8x384xf32> -> vector<8x384xf32>
    %14 = arith.addf %10, %13 : vector<8x384xf32>
    %c0_12 = arith.constant 0 : index
    %c0_13 = arith.constant 0 : index
    %15 = vector.load %arg6[%c0_12, %c0_13] : memref<1x384xf32, #tpu.memory_space<vmem>>, vector<1x384xf32>
    %16 = vector.broadcast %15 : vector<1x384xf32> to vector<8x384xf32>
    %17 = arith.addf %14, %16 : vector<8x384xf32>
    %cst_14 = arith.constant 0.000000e+00 : f32
    %18 = vector.broadcast %cst_14 : f32 to vector<8x384xf32>
    %19 = arith.maximumf %17, %18 : vector<8x384xf32>
    %20 = arith.truncf %19 : vector<8x384xf32> to vector<8x384xbf16>
    %c0_15 = arith.constant 0 : index
    %c0_16 = arith.constant 0 : index
    %21 = vector.load %arg7[%c0_15, %c0_16] : memref<384x384xbf16, #tpu.memory_space<vmem>>, vector<384x384xbf16>
    %cst_17 = arith.constant dense<0.000000e+00> : vector<8x384xf32>
    %22 = tpu.matmul %20, %21, %cst_17 {dimension_numbers = #tpu.dot_dimension_numbers<[1], [0], [0], [1], [0, 0, 1, 1], [], []>} : vector<8x384xbf16>, vector<384x384xbf16>, vector<8x384xf32> -> vector<8x384xf32>
    %c0_18 = arith.constant 0 : index
    %c0_19 = arith.constant 0 : index
    %23 = vector.load %arg8[%c0_18, %c0_19] : memref<1x384xf32, #tpu.memory_space<vmem>>, vector<1x384xf32>
    %24 = vector.broadcast %23 : vector<1x384xf32> to vector<8x384xf32>
    %25 = arith.addf %22, %24 : vector<8x384xf32>
    %cst_20 = arith.constant 0.000000e+00 : f32
    %26 = vector.broadcast %cst_20 : f32 to vector<8x384xf32>
    %27 = arith.maximumf %25, %26 : vector<8x384xf32>
    %28 = arith.truncf %27 : vector<8x384xf32> to vector<8x384xbf16>
    %c0_21 = arith.constant 0 : index
    %c0_22 = arith.constant 0 : index
    %29 = vector.load %arg9[%c0_21, %c0_22] : memref<384x384xbf16, #tpu.memory_space<vmem>>, vector<384x384xbf16>
    %cst_23 = arith.constant dense<0.000000e+00> : vector<8x384xf32>
    %30 = tpu.matmul %28, %29, %cst_23 {dimension_numbers = #tpu.dot_dimension_numbers<[1], [0], [0], [1], [0, 0, 1, 1], [], []>} : vector<8x384xbf16>, vector<384x384xbf16>, vector<8x384xf32> -> vector<8x384xf32>
    %c0_24 = arith.constant 0 : index
    %c0_25 = arith.constant 0 : index
    %31 = vector.load %arg10[%c0_24, %c0_25] : memref<1x384xf32, #tpu.memory_space<vmem>>, vector<1x384xf32>
    %32 = vector.broadcast %31 : vector<1x384xf32> to vector<8x384xf32>
    %33 = arith.addf %30, %32 : vector<8x384xf32>
    %cst_26 = arith.constant 0.000000e+00 : f32
    %34 = vector.broadcast %cst_26 : f32 to vector<8x384xf32>
    %35 = arith.maximumf %33, %34 : vector<8x384xf32>
    %c0_27 = arith.constant 0 : index
    %c0_28 = arith.constant 0 : index
    %36 = vector.load %arg11[%c0_27, %c0_28] : memref<1x384xf32, #tpu.memory_space<vmem>>, vector<1x384xf32>
    %37 = vector.broadcast %36 : vector<1x384xf32> to vector<8x384xf32>
    %38 = arith.mulf %35, %37 : vector<8x384xf32>
    %cst_29 = arith.constant dense<0.000000e+00> : vector<8xf32>
    %39 = vector.multi_reduction <add>, %38, %cst_29 [1] : vector<8x384xf32> to vector<8xf32>
    %40 = vector.shape_cast %39 : vector<8xf32> to vector<8x1xf32>
    %c0_30 = arith.constant 0 : index
    %c0_31 = arith.constant 0 : index
    %41 = vector.load %arg12[%c0_30, %c0_31] : memref<1x1xf32, #tpu.memory_space<vmem>>, vector<1x1xf32>
    %42 = vector.broadcast %41 : vector<1x1xf32> to vector<8x1xf32>
    %43 = arith.addf %40, %42 : vector<8x1xf32>
    %44 = arith.negf %43 : vector<8x1xf32>
    %45 = math.exp %44 : vector<8x1xf32>
    %cst_32 = arith.constant 1.000000e+00 : f32
    %46 = vector.broadcast %cst_32 : f32 to vector<8x1xf32>
    %47 = arith.addf %46, %45 : vector<8x1xf32>
    %48 = arith.divf %46, %47 : vector<8x1xf32>
    %c0_33 = arith.constant 0 : index
    %c0_34 = arith.constant 0 : index
    %49 = vector.load %arg13[%c0_33, %c0_34] : memref<8x1xf32, #tpu.memory_space<vmem>>, vector<8x1xf32>
    tpu.vector_store %arg13[%c0_33, %c0_34], %48 {strides = array<i32>} : memref<8x1xf32, #tpu.memory_space<vmem>>, vector<8x1xf32>,
    return
  }
  func.func @transform_0(%arg0: i32) -> (i32, i32) {
    %c0_i32 = arith.constant 0 : i32
    %c0_i32_0 = arith.constant 0 : i32
    return %arg0, %c0_i32 : i32, i32
  }
  func.func @transform_1(%arg0: i32) -> (i32, i32) {
    %c0_i32 = arith.constant 0 : i32
    %c0_i32_0 = arith.constant 0 : i32
    %c0_i32_1 = arith.constant 0 : i32
    return %c0_i32, %c0_i32_0 : i32, i32
  }
  func.func @transform_2(%arg0: i32) -> (i32, i32) {
    %c0_i32 = arith.constant 0 : i32
    %c0_i32_0 = arith.constant 0 : i32
    %c0_i32_1 = arith.constant 0 : i32
    return %c0_i32, %c0_i32_0 : i32, i32
  }
  func.func @transform_3(%arg0: i32) -> (i32, i32) {
    %c0_i32 = arith.constant 0 : i32
    %c0_i32_0 = arith.constant 0 : i32
    %c0_i32_1 = arith.constant 0 : i32
    return %c0_i32, %c0_i32_0 : i32, i32
  }
  func.func @transform_4(%arg0: i32) -> (i32, i32) {
    %c0_i32 = arith.constant 0 : i32
    %c0_i32_0 = arith.constant 0 : i32
    %c0_i32_1 = arith.constant 0 : i32
    return %c0_i32, %c0_i32_0 : i32, i32
  }
  func.func @transform_5(%arg0: i32) -> (i32, i32) {
    %c0_i32 = arith.constant 0 : i32
    %c0_i32_0 = arith.constant 0 : i32
    %c0_i32_1 = arith.constant 0 : i32
    return %c0_i32, %c0_i32_0 : i32, i32
  }
  func.func @transform_6(%arg0: i32) -> (i32, i32) {
    %c0_i32 = arith.constant 0 : i32
    %c0_i32_0 = arith.constant 0 : i32
    %c0_i32_1 = arith.constant 0 : i32
    return %c0_i32, %c0_i32_0 : i32, i32
  }
  func.func @transform_7(%arg0: i32) -> (i32, i32) {
    %c0_i32 = arith.constant 0 : i32
    %c0_i32_0 = arith.constant 0 : i32
    %c0_i32_1 = arith.constant 0 : i32
    return %c0_i32, %c0_i32_0 : i32, i32
  }
  func.func @transform_8(%arg0: i32) -> (i32, i32) {
    %c0_i32 = arith.constant 0 : i32
    %c0_i32_0 = arith.constant 0 : i32
    %c0_i32_1 = arith.constant 0 : i32
    return %c0_i32, %c0_i32_0 : i32, i32
  }
  func.func @transform_9(%arg0: i32) -> (i32, i32) {
    %c0_i32 = arith.constant 0 : i32
    %c0_i32_0 = arith.constant 0 : i32
    %c0_i32_1 = arith.constant 0 : i32
    return %c0_i32, %c0_i32_0 : i32, i32
  }
  func.func @transform_10(%arg0: i32) -> (i32, i32) {
    %c0_i32 = arith.constant 0 : i32
    %c0_i32_0 = arith.constant 0 : i32
    %c0_i32_1 = arith.constant 0 : i32
    return %c0_i32, %c0_i32_0 : i32, i32
  }
  func.func @transform_11(%arg0: i32) -> (i32, i32) {
    %c0_i32 = arith.constant 0 : i32
    %c0_i32_0 = arith.constant 0 : i32
    %c0_i32_1 = arith.constant 0 : i32
    return %c0_i32, %c0_i32_0 : i32, i32
  }
  func.func @transform_12(%arg0: i32) -> (i32, i32) {
    %c0_i32 = arith.constant 0 : i32
    %c0_i32_0 = arith.constant 0 : i32
    return %arg0, %c0_i32 : i32, i32
  }
}

</mosaic_0001>

<bundles_post_ra>
// kernel: tpu_custom_call.1
= control target key start
LH: loop header
LB: loop body
LE: loop exit
PB: predicated region body
PF: predicated region fallthrough
CT: control target
= control target key end

     0   :  { %s4487_s0 = inlined_call_operand.hbm [shape: bf16[8,128], index: 0, kind: input, shape index: {}]   ;;  %s4488_s1 = inlined_call_operand.hbm [shape: bf16[128,1024], index: 1, kind: input, shape index: {}]   ;;  %s4489_s2 = inlined_call_operand.hbm [shape: bf16[512,128], index: 2, kind: input, shape index: {}]   ;;  %s4490_s3 = inlined_call_operand.hbm [shape: bf16[128,384], index: 3, kind: input, shape index: {}]   ;;  %s4491_s4 = inlined_call_operand.hbm [shape: bf16[128,384], index: 4, kind: input, shape index: {}]   ;;  %s4492_s5 = inlined_call_operand.vmem [shape: f32[1,384], index: 5, kind: input, shape index: {}]   ;;  %s4493_s6 = inlined_call_operand.hbm [shape: bf16[384,384], index: 6, kind: input, shape index: {}]   ;;  %s4494_s7 = inlined_call_operand.vmem [shape: f32[1,384], index: 7, kind: input, shape index: {}]   ;;  %s4495_s8 = inlined_call_operand.hbm [shape: bf16[384,384], index: 8, kind: input, shape index: {}]   ;;  %s4496_s9 = inlined_call_operand.vmem [shape: f32[1,384], index: 9, kind: input, shape index: {}]   ;;  %s4497_s10 = inlined_call_operand.hbm [shape: f32[1,384], index: 10, kind: input, shape index: {}]   ;;  %s4498_s11 = inlined_call_operand.<no memory space> [shape: f32[1,1], index: 11, kind: input, shape index: {}]   ;;  %s4499_s12 = inlined_call_operand.vmem [shape: f32[8,1], index: 12, kind: output, shape index: {}]  }
   0x1   :  { %v17_v0 = vstv %s4498_s11 }
   0x2   :  { %18 = vst [vmem:[#allocation2] sm:$0x1] %v17_v0 }
   0x3   :  { %19 = vsyncpa [#allocation4], 0 }
   0x4   :  { %20 = vsyncpa [#allocation6], 0 }
   0x5   :  { %21 = vsyncpa [#allocation9], 0 }
   0x6   :  { %22 = vsyncpa [#allocation12], 0  ;;  %s39_s25 = sshll.u32 %s4488_s1, 4  ;;  %s40_s25 = int_to_ptr.hbm [resolvable:$true] %s39_s25 }
   0x7   :  { %23 = vsyncpa [#allocation15], 0  ;;  %s4316_s26 = smov [#allocation5]   ;;  %s65_s30 = sshll.u32 %s4490_s3, 4  ;;  %s66_s30 = int_to_ptr.hbm [resolvable:$true] %s65_s30 }
   0x8   :  { %s41_s27 = sshll.u32 %s4316_s26, 4  ;;  %s4317_s13 = smov 512   ;;  %s42_s27 = int_to_ptr.vmem [resolvable:$true] %s41_s27 }
   0x9   :  { %s4318_s11 = smov 32   ;;  %s4319_s14 = smov [#allocation8]  }
   0xa   :  { %47 = dma.hbm_to_vmem [thread:$0]  %s40_s25, 8192, %s42_s27, [#allocation6], %s4317_s13, %s4317_s13, %s4318_s11  }
   0xb   :  { %s67_s15 = sshll.u32 %s4319_s14, 4  ;;  %s4320_s16 = smov 192   ;;  %s68_s15 = int_to_ptr.vmem [resolvable:$true] %s67_s15 }
   0xc   :  { %s4321_s17 = smov 12   ;;  %s93_s19 = sshll.u32 %s4493_s6, 4  ;;  %s94_s19 = int_to_ptr.hbm [resolvable:$true] %s93_s19 }
   0xd   :  { %73 = dma.hbm_to_vmem [thread:$0]  %s66_s30, 3072, %s68_s15, [#allocation9], %s4320_s16, %s4320_s16, %s4321_s17  }
   0xe   :  { %s4322_s20 = smov [#allocation11]   ;;  %s29_s23 = sshll.u32 %s4487_s0, 4  ;;  %s30_s23 = int_to_ptr.hbm [resolvable:$true] %s29_s23 }
   0xf   :  { %s95_s3 = sshll.u32 %s4322_s20, 4  ;;  %s4323_s24 = smov [#allocation3]   ;;  %s96_s3 = int_to_ptr.vmem [resolvable:$true] %s95_s3 }
  0x10   :  { %101 = dma.hbm_to_vmem [thread:$0]  %s94_s19, 9216, %s96_s3, [#allocation12], %s4320_s16, %s4320_s16, %s4321_s17  }
  0x11   :  { %s31_s25 = sshll.u32 %s4323_s24, 4  ;;  %s52_s28 = sshll.u32 %s4489_s2, 4  ;;  %s32_s25 = int_to_ptr.vmem [resolvable:$true] %s31_s25  ;;  %s53_s28 = int_to_ptr.hbm [resolvable:$true] %s52_s28 }
  0x12   :  { %34 = dma.hbm_to_vmem [thread:$0]  %s30_s23, 64, %s32_s25, [#allocation4]  }
  0x13   :  { %s4324_s6 = smov [#allocation7]   ;;  %s78_s0 = sshll.u32 %s4491_s4, 4  ;;  %s79_s0 = int_to_ptr.hbm [resolvable:$true] %s78_s0 }
  0x14   :  { %s54_s29 = sshll.u32 %s4324_s6, 4  ;;  %s4325_s11 = smov 64   ;;  %s55_s29 = int_to_ptr.vmem [resolvable:$true] %s54_s29 }
  0x15   :  { %s4326_s14 = smov 4   ;;  %s4327_s15 = smov [#allocation10]  }
  0x16   :  { %60 = dma.hbm_to_vmem [thread:$0]  %s53_s28, 4096, %s55_s29, [#allocation6], %s4325_s11, %s4325_s11, %s4326_s14  }
  0x17   :  { %s80_s1 = sshll.u32 %s4327_s15, 4  ;;  %s108_s2 = sshll.u32 %s4495_s8, 4  ;;  %s81_s1 = int_to_ptr.vmem [resolvable:$true] %s80_s1  ;;  %s109_s2 = int_to_ptr.hbm [resolvable:$true] %s108_s2 }
  0x18   :  { %86 = dma.hbm_to_vmem [thread:$0]  %s79_s0, 3072, %s81_s1, [#allocation9], %s4320_s16, %s4320_s16, %s4321_s17  }
  0x19   :  { %s124_s4 = sshll.u32 %s4497_s10, 4  ;;  %s4328_s21 = smov [#allocation13]   ;;  %s125_s4 = int_to_ptr.hbm [resolvable:$true] %s124_s4 }
  0x1a   :  { %s110_s22 = sshll.u32 %s4328_s21, 4  ;;  %s4329_s23 = smov [#allocation14]   ;;  %s111_s22 = int_to_ptr.vmem [resolvable:$true] %s110_s22 }
  0x1b   :  { %116 = dma.hbm_to_vmem [thread:$0]  %s109_s2, 9216, %s111_s22, [#allocation12], %s4320_s16, %s4320_s16, %s4321_s17  }
  0x1c   :  { %s126_s8 = sshll.u32 %s4329_s23, 4  ;;  %s127_s8 = int_to_ptr.vmem [resolvable:$true] %s126_s8 }
  0x1d   :  { %129 = dma.hbm_to_vmem [thread:$0]  %s125_s4, 48, %s127_s8, [#allocation15]  }
  0x1e   :  { %4306 = dma.done.wait [#allocation4], 64  }
  0x1f   :  { %4307 = vsyncadd [#allocation4], 4294967232 }
  0x20   :  { %4308 = dma.done.wait [#allocation6], 12288  }
  0x21   :  { %4309 = vsyncadd [#allocation6], 4294955008 }
  0x22   :  { %4310 = dma.done.wait [#allocation9], 6144  }
  0x23   :  { %4311 = vsyncadd [#allocation9], 4294961152 }
  0x24   :  { %4312 = dma.done.wait [#allocation12], 18432  }
  0x25   :  { %4313 = vsyncadd [#allocation12], 4294948864 }
  0x26   :  { %4314 = dma.done.wait [#allocation15], 48  }
  0x27   :  { %4315 = vsyncadd [#allocation15], 4294967248  ;;  %v2880_v1 = vld [vmem:[#allocation5 + $0x1c0] sm:$0xf]  ;;  %v3863_v3 = vld [vmem:[#allocation5 + $0x1c4] sm:$0xf] }
  0x28   :  { %v3867_v2 = vld [vmem:[#allocation5 + $0x1dc] sm:$0xf0]  ;;  %v2882_v5 = vld [vmem:[#allocation5 + $0x1e0] sm:$0xf0]  ;;  %v2888_v6 = vld [vmem:[#allocation5 + $0x1c8] sm:$0xf] }
  0x29   :  { %v2881_v4 = vor.u32 %v3867_v2, %v2880_v1  ;;  %v3868_v7 = vld [vmem:[#allocation5 + $0x1e4] sm:$0xf0]  ;;  %v2885_v8 = vor.u32 %v3863_v3, %v2882_v5  ;;  %v3864_v10 = vld [vmem:[#allocation5 + $0x1cc] sm:$0xf]  ;;  %v2848_v12 = vld [vmem:[#allocation5 + $0x180] sm:$0xf] }
  0x2a   :  { %v2889_v9 = vor.u32 %v3868_v7, %v2888_v6  ;;  %v2890_v11 = vld [vmem:[#allocation5 + $0x1e8] sm:$0xf0]  ;;  %v3859_v14 = vld [vmem:[#allocation5 + $0x19c] sm:$0xf0]  ;;  %v3855_v15 = vld [vmem:[#allocation5 + $0x184] sm:$0xf] }
  0x2b   :  { %549 = vmatpush.bf16.msra.mxu0 %v2881_v4  ;;  %v2893_v13 = vor.u32 %v3864_v10, %v2890_v11  ;;  %v2850_v16 = vld [vmem:[#allocation5 + $0x1a0] sm:$0xf0]  ;;  %562 = vmatpush.bf16.msra.mxu1 %v2885_v8  ;;  %v2849_v17 = vor.u32 %v3859_v14, %v2848_v12  ;;  %v2856_v19 = vld [vmem:[#allocation5 + $0x188] sm:$0xf]  ;;  %v3856_v21 = vld [vmem:[#allocation5 + $0x18c] sm:$0xf] }
  0x2c   :  { %575 = vmatpush.bf16.msra.mxu2 %v2889_v9  ;;  %v2853_v18 = vor.u32 %v3855_v15, %v2850_v16  ;;  %v3860_v20 = vld [vmem:[#allocation5 + $0x1a4] sm:$0xf0]  ;;  %v2858_v23 = vld [vmem:[#allocation5 + $0x1a8] sm:$0xf0]  ;;  %v2816_v24 = vld [vmem:[#allocation5 + $0x140] sm:$0xf] }
  0x2d   :  { %588 = vmatpush.bf16.msra.mxu3 %v2893_v13  ;;  %v2857_v22 = vor.u32 %v3860_v20, %v2856_v19  ;;  %v3851_v25 = vld [vmem:[#allocation5 + $0x15c] sm:$0xf0]  ;;  %v2861_v26 = vor.u32 %v3856_v21, %v2858_v23  ;;  %v3847_v27 = vld [vmem:[#allocation5 + $0x144] sm:$0xf]  ;;  %v2824_v29 = vld [vmem:[#allocation5 + $0x148] sm:$0xf] }
  0x2e   :  { %v2818_v28 = vld [vmem:[#allocation5 + $0x160] sm:$0xf0]  ;;  %v2817_v30 = vor.u32 %v3851_v25, %v2816_v24  ;;  %v3852_v31 = vld [vmem:[#allocation5 + $0x164] sm:$0xf0]  ;;  %v3848_v32 = vld [vmem:[#allocation5 + $0x14c] sm:$0xf] }
  0x2f   :  { %550 = vmatpush.bf16.msra.mxu0 %v2849_v17  ;;  %v2826_v33 = vld [vmem:[#allocation5 + $0x168] sm:$0xf0]  ;;  %563 = vmatpush.bf16.msra.mxu1 %v2853_v18  ;;  %v2821_v34 = vor.u32 %v3847_v27, %v2818_v28  ;;  %v2825_v35 = vor.u32 %v3852_v31, %v2824_v29  ;;  %v2784_v36 = vld [vmem:[#allocation5 + $0x100] sm:$0xf]  ;;  %v3839_v38 = vld [vmem:[#allocation5 + $0x104] sm:$0xf] }
  0x30   :  { %576 = vmatpush.bf16.msra.mxu2 %v2857_v22  ;;  %v3843_v37 = vld [vmem:[#allocation5 + $0x11c] sm:$0xf0]  ;;  %v2829_v39 = vor.u32 %v3848_v32, %v2826_v33  ;;  %v2786_v40 = vld [vmem:[#allocation5 + $0x120] sm:$0xf0]  ;;  %v2792_v41 = vld [vmem:[#allocation5 + $0x108] sm:$0xf] }
  0x31   :  { %589 = vmatpush.bf16.msra.mxu3 %v2861_v26  ;;  %v3844_v42 = vld [vmem:[#allocation5 + $0x124] sm:$0xf0]  ;;  %v3840_v43 = vld [vmem:[#allocation5 + $0x10c] sm:$0xf]  ;;  %v2785_v45 = vor.u32 %v3843_v37, %v2784_v36  ;;  %v2789_v46 = vor.u32 %v3839_v38, %v2786_v40  ;;  %v2752_v48 = vld [vmem:[#allocation5 + $0xc0] sm:$0xf] }
  0x32   :  { %v2794_v44 = vld [vmem:[#allocation5 + $0x128] sm:$0xf0]  ;;  %v2793_v47 = vor.u32 %v3844_v42, %v2792_v41  ;;  %v3835_v49 = vld [vmem:[#allocation5 + $0xdc] sm:$0xf0]  ;;  %v3831_v50 = vld [vmem:[#allocation5 + $0xc4] sm:$0xf] }
  0x33   :  { %551 = vmatpush.bf16.msra.mxu0 %v2817_v30  ;;  %564 = vmatpush.bf16.msra.mxu1 %v2821_v34  ;;  %v2797_v51 = vor.u32 %v3840_v43, %v2794_v44  ;;  %v2754_v52 = vld [vmem:[#allocation5 + $0xe0] sm:$0xf0]  ;;  %v2760_v53 = vld [vmem:[#allocation5 + $0xc8] sm:$0xf]  ;;  %v3832_v55 = vld [vmem:[#allocation5 + $0xcc] sm:$0xf]  ;;  %v2753_v57 = vor.u32 %v3835_v49, %v2752_v48 }
  0x34   :  { %577 = vmatpush.bf16.msra.mxu2 %v2825_v35  ;;  %v3836_v54 = vld [vmem:[#allocation5 + $0xe4] sm:$0xf0]  ;;  %v2762_v56 = vld [vmem:[#allocation5 + $0xe8] sm:$0xf0]  ;;  %v2757_v58 = vor.u32 %v3831_v50, %v2754_v52  ;;  %v2720_v60 = vld [vmem:[#allocation5 + $0x80] sm:$0xf] }
  0x35   :  { %590 = vmatpush.bf16.msra.mxu3 %v2829_v39  ;;  %v2761_v59 = vor.u32 %v3836_v54, %v2760_v53  ;;  %v3827_v61 = vld [vmem:[#allocation5 + $0x9c] sm:$0xf0]  ;;  %v3823_v62 = vld [vmem:[#allocation5 + $0x84] sm:$0xf]  ;;  %v2765_v63 = vor.u32 %v3832_v55, %v2762_v56  ;;  %v2728_v1 = vld [vmem:[#allocation5 + $0x88] sm:$0xf] }
  0x36   :  { %v2722_v0 = vld [vmem:[#allocation5 + $0xa0] sm:$0xf0]  ;;  %v3828_v2 = vld [vmem:[#allocation5 + $0xa4] sm:$0xf0]  ;;  %v3824_v3 = vld [vmem:[#allocation5 + $0x8c] sm:$0xf]  ;;  %v2721_v5 = vor.u32 %v3827_v61, %v2720_v60 }
  0x37   :  { %552 = vmatpush.bf16.msra.mxu0 %v2785_v45  ;;  %565 = vmatpush.bf16.msra.mxu1 %v2789_v46  ;;  %v2730_v4 = vld [vmem:[#allocation5 + $0xa8] sm:$0xf0]  ;;  %v2725_v6 = vor.u32 %v3823_v62, %v2722_v0  ;;  %v2729_v7 = vor.u32 %v3828_v2, %v2728_v1  ;;  %v2688_v8 = vld [vmem:[#allocation5 + $0x40] sm:$0xf]  ;;  %v3815_v10 = vld [vmem:[#allocation5 + $0x44] sm:$0xf] }
  0x38   :  { %578 = vmatpush.bf16.msra.mxu2 %v2793_v47  ;;  %v3819_v9 = vld [vmem:[#allocation5 + $0x5c] sm:$0xf0]  ;;  %v2733_v11 = vor.u32 %v3824_v3, %v2730_v4  ;;  %v2690_v12 = vld [vmem:[#allocation5 + $0x60] sm:$0xf0]  ;;  %v2696_v13 = vld [vmem:[#allocation5 + $0x48] sm:$0xf] }
  0x39   :  { %591 = vmatpush.bf16.msra.mxu3 %v2797_v51  ;;  %v3820_v14 = vld [vmem:[#allocation5 + $0x64] sm:$0xf0]  ;;  %v3816_v15 = vld [vmem:[#allocation5 + $0x4c] sm:$0xf]  ;;  %v2689_v17 = vor.u32 %v3819_v9, %v2688_v8  ;;  %v2656_v18 = vld [vmem:[#allocation5] sm:$0xf]  ;;  %v2693_v20 = vor.u32 %v3815_v10, %v2690_v12 }
  0x3a   :  { %v2698_v16 = vld [vmem:[#allocation5 + $0x68] sm:$0xf0]  ;;  %v3811_v19 = vld [vmem:[#allocation5 + $0x1c] sm:$0xf0]  ;;  %v2697_v21 = vor.u32 %v3820_v14, %v2696_v13  ;;  %v3807_v22 = vld [vmem:[#allocation5 + $0x4] sm:$0xf] }
  0x3b   :  { %553 = vmatpush.bf16.msra.mxu0 %v2753_v57  ;;  %566 = vmatpush.bf16.msra.mxu1 %v2757_v58  ;;  %v2658_v23 = vld [vmem:[#allocation5 + $0x20] sm:$0xf0]  ;;  %v2664_v24 = vld [vmem:[#allocation5 + $0x8] sm:$0xf]  ;;  %v2701_v25 = vor.u32 %v3816_v15, %v2698_v16  ;;  %v3808_v27 = vld [vmem:[#allocation5 + $0xc] sm:$0xf]  ;;  %v2657_v32 = vor.u32 %v3811_v19, %v2656_v18 }
  0x3c   :  { %579 = vmatpush.bf16.msra.mxu2 %v2761_v59  ;;  %v3812_v26 = vld [vmem:[#allocation5 + $0x24] sm:$0xf0]  ;;  %v2666_v28 = vld [vmem:[#allocation5 + $0x28] sm:$0xf0]  ;;  %v2896_v29 = vld [vmem:[#allocation5 + $0x1d0] sm:$0xf]  ;;  %v2661_v36 = vor.u32 %v3807_v22, %v2658_v23 }
  0x3d   :  { %592 = vmatpush.bf16.msra.mxu3 %v2765_v63  ;;  %v3869_v30 = vld [vmem:[#allocation5 + $0x1ec] sm:$0xf0]  ;;  %v3865_v31 = vld [vmem:[#allocation5 + $0x1d4] sm:$0xf]  ;;  %v2904_v34 = vld [vmem:[#allocation5 + $0x1d8] sm:$0xf]  ;;  %v2665_v37 = vor.u32 %v3812_v26, %v2664_v24  ;;  %v2669_v40 = vor.u32 %v3808_v27, %v2666_v28 }
  0x3e   :  { %v2898_v33 = vld [vmem:[#allocation5 + $0x1f0] sm:$0xf0]  ;;  %v3870_v35 = vld [vmem:[#allocation5 + $0x1f4] sm:$0xf0]  ;;  %v3866_v38 = vld [vmem:[#allocation5 + $0x1dc] sm:$0xf]  ;;  %v2897_v41 = vor.u32 %v3869_v30, %v2896_v29 }
  0x3f   :  { %554 = vmatpush.bf16.msra.mxu0 %v2721_v5  ;;  %567 = vmatpush.bf16.msra.mxu1 %v2725_v6  ;;  %v2906_v39 = vld [vmem:[#allocation5 + $0x1f8] sm:$0xf0]  ;;  %v2901_v42 = vor.u32 %v3865_v31, %v2898_v33  ;;  %v2905_v43 = vor.u32 %v3870_v35, %v2904_v34  ;;  %v2864_v44 = vld [vmem:[#allocation5 + $0x190] sm:$0xf]  ;;  %v3857_v46 = vld [vmem:[#allocation5 + $0x194] sm:$0xf] }
  0x40   :  { %580 = vmatpush.bf16.msra.mxu2 %v2729_v7  ;;  %v3861_v45 = vld [vmem:[#allocation5 + $0x1ac] sm:$0xf0]  ;;  %v2909_v47 = vor.u32 %v3866_v38, %v2906_v39  ;;  %v2866_v48 = vld [vmem:[#allocation5 + $0x1b0] sm:$0xf0]  ;;  %v2872_v49 = vld [vmem:[#allocation5 + $0x198] sm:$0xf] }
  0x41   :  { %593 = vmatpush.bf16.msra.mxu3 %v2733_v11  ;;  %v3862_v50 = vld [vmem:[#allocation5 + $0x1b4] sm:$0xf0]  ;;  %v3858_v51 = vld [vmem:[#allocation5 + $0x19c] sm:$0xf]  ;;  %v2865_v54 = vor.u32 %v3861_v45, %v2864_v44  ;;  %v2869_v55 = vor.u32 %v3857_v46, %v2866_v48  ;;  %v2832_v57 = vld [vmem:[#allocation5 + $0x150] sm:$0xf] }
  0x42   :  { %v2874_v52 = vld [vmem:[#allocation5 + $0x1b8] sm:$0xf0]  ;;  %v2873_v56 = vor.u32 %v3862_v50, %v2872_v49  ;;  %v3853_v58 = vld [vmem:[#allocation5 + $0x16c] sm:$0xf0]  ;;  %v3849_v59 = vld [vmem:[#allocation5 + $0x154] sm:$0xf] }
  0x43   :  { %555 = vmatpush.bf16.msra.mxu0 %v2689_v17  ;;  %568 = vmatpush.bf16.msra.mxu1 %v2693_v20  ;;  %v4434_v53 = vld [vmem:[#allocation3] sm:$0xf]  ;;  %v2877_v60 = vor.u32 %v3858_v51, %v2874_v52  ;;  %v2834_v61 = vld [vmem:[#allocation5 + $0x170] sm:$0xf0]  ;;  %v2840_v62 = vld [vmem:[#allocation5 + $0x158] sm:$0xf]  ;;  %v2833_v2 = vor.u32 %v3853_v58, %v2832_v57 }
  0x44   :  { %581 = vmatpush.bf16.msra.mxu2 %v2697_v21  ;;  %v3854_v63 = vld [vmem:[#allocation5 + $0x174] sm:$0xf0]  ;;  %v3850_v0 = vld [vmem:[#allocation5 + $0x15c] sm:$0xf]  ;;  %v2837_v3 = vor.u32 %v3849_v59, %v2834_v61  ;;  %v2800_v5 = vld [vmem:[#allocation5 + $0x110] sm:$0xf] }
  0x45   :  { %594 = vmatpush.bf16.msra.mxu3 %v2701_v25  ;;  %v2842_v1 = vld [vmem:[#allocation5 + $0x178] sm:$0xf0]  ;;  %v2841_v4 = vor.u32 %v3854_v63, %v2840_v62  ;;  %v3845_v6 = vld [vmem:[#allocation5 + $0x12c] sm:$0xf0]  ;;  %v3841_v7 = vld [vmem:[#allocation5 + $0x114] sm:$0xf] }
  0x46   :  { %v2845_v8 = vor.u32 %v3850_v0, %v2842_v1  ;;  %v2802_v9 = vld [vmem:[#allocation5 + $0x130] sm:$0xf0]  ;;  %v2808_v10 = vld [vmem:[#allocation5 + $0x118] sm:$0xf]  ;;  %v3842_v12 = vld [vmem:[#allocation5 + $0x11c] sm:$0xf]  ;;  %v2801_v14 = vor.u32 %v3845_v6, %v2800_v5 }
  0x47   :  { %556 = vmatpush.bf16.msra.mxu0 %v2657_v32  ;;  %569 = vmatpush.bf16.msra.mxu1 %v2661_v36  ;;  %v3846_v11 = vld [vmem:[#allocation5 + $0x134] sm:$0xf0]  ;;  %v2810_v13 = vld [vmem:[#allocation5 + $0x138] sm:$0xf0]  ;;  %v2805_v15 = vor.u32 %v3841_v7, %v2802_v9  ;;  %v2768_v17 = vld [vmem:[#allocation5 + $0xd0] sm:$0xf] }
  0x48   :  { %582 = vmatpush.bf16.msra.mxu2 %v2665_v37  ;;  %v2809_v16 = vor.u32 %v3846_v11, %v2808_v10  ;;  %v3837_v18 = vld [vmem:[#allocation5 + $0xec] sm:$0xf0]  ;;  %v3833_v19 = vld [vmem:[#allocation5 + $0xd4] sm:$0xf]  ;;  %v2813_v20 = vor.u32 %v3842_v12, %v2810_v13  ;;  %v2776_v22 = vld [vmem:[#allocation5 + $0xd8] sm:$0xf] }
  0x49   :  { %595 = vmatpush.bf16.msra.mxu3 %v2669_v40  ;;  %v2770_v21 = vld [vmem:[#allocation5 + $0xf0] sm:$0xf0]  ;;  %v3838_v23 = vld [vmem:[#allocation5 + $0xf4] sm:$0xf0]  ;;  %v3834_v24 = vld [vmem:[#allocation5 + $0xdc] sm:$0xf]  ;;  %v2769_v26 = vor.u32 %v3837_v18, %v2768_v17 }
  0x4a   :  { %557 = vmatmul.bf16.vlgmr.msra.gmra.mxu0 %v4434_v53  ;;  %570 = vmatmul.bf16.vlgmr.msra.gmra.mxu1 %v4434_v53  ;;  %v2778_v25 = vld [vmem:[#allocation5 + $0xf8] sm:$0xf0]  ;;  %v2773_v27 = vor.u32 %v3833_v19, %v2770_v21  ;;  %v2777_v28 = vor.u32 %v3838_v23, %v2776_v22  ;;  %v2736_v29 = vld [vmem:[#allocation5 + $0x90] sm:$0xf]  ;;  %v3825_v31 = vld [vmem:[#allocation5 + $0x94] sm:$0xf] }
  0x4b   :  { %601 = vmatpush.bf16.msrb.mxu0 %v2897_v41  ;;  %614 = vmatpush.bf16.msrb.mxu1 %v2901_v42  ;;  %v3829_v30 = vld [vmem:[#allocation5 + $0xac] sm:$0xf0]  ;;  %v2781_v32 = vor.u32 %v3834_v24, %v2778_v25  ;;  %v2738_v33 = vld [vmem:[#allocation5 + $0xb0] sm:$0xf0]  ;;  %v2744_v34 = vld [vmem:[#allocation5 + $0x98] sm:$0xf] }
  0x4c   :  { %627 = vmatpush.bf16.msrb.mxu2 %v2905_v43  ;;  %596 = vmatmul.bf16.vlgmr.msra.gmra.mxu3 %v4434_v53  ;;  %v3830_v35 = vld [vmem:[#allocation5 + $0xb4] sm:$0xf0]  ;;  %v3826_v36 = vld [vmem:[#allocation5 + $0x9c] sm:$0xf]  ;;  %v2737_v38 = vor.u32 %v3829_v30, %v2736_v29  ;;  %v2741_v39 = vor.u32 %v3825_v31, %v2738_v33  ;;  %v2704_v41 = vld [vmem:[#allocation5 + $0x50] sm:$0xf] }
  0x4d   :  { %640 = vmatpush.bf16.msrb.mxu3 %v2909_v47  ;;  %583 = vmatmul.bf16.vlgmr.msra.gmra.mxu2 %v4434_v53  ;;  %v2746_v37 = vld [vmem:[#allocation5 + $0xb8] sm:$0xf0]  ;;  %v2745_v40 = vor.u32 %v3830_v35, %v2744_v34  ;;  %v3821_v42 = vld [vmem:[#allocation5 + $0x6c] sm:$0xf0]  ;;  %v3817_v43 = vld [vmem:[#allocation5 + $0x54] sm:$0xf] }
  0x4e   :  { %v2749_v44 = vor.u32 %v3826_v36, %v2746_v37  ;;  %v2706_v45 = vld [vmem:[#allocation5 + $0x70] sm:$0xf0]  ;;  %v2712_v46 = vld [vmem:[#allocation5 + $0x58] sm:$0xf]  ;;  %v3818_v48 = vld [vmem:[#allocation5 + $0x5c] sm:$0xf]  ;;  %v2705_v50 = vor.u32 %v3821_v42, %v2704_v41 }
  0x4f   :  { %602 = vmatpush.bf16.msrb.mxu0 %v2865_v54  ;;  %615 = vmatpush.bf16.msrb.mxu1 %v2869_v55  ;;  %v3822_v47 = vld [vmem:[#allocation5 + $0x74] sm:$0xf0]  ;;  %v2714_v49 = vld [vmem:[#allocation5 + $0x78] sm:$0xf0]  ;;  %v2709_v51 = vor.u32 %v3817_v43, %v2706_v45  ;;  %v2672_v54 = vld [vmem:[#allocation5 + $0x10] sm:$0xf] }
  0x50   :  { %628 = vmatpush.bf16.msrb.mxu2 %v2873_v56  ;;  %v2713_v52 = vor.u32 %v3822_v47, %v2712_v46  ;;  %v3813_v55 = vld [vmem:[#allocation5 + $0x2c] sm:$0xf0]  ;;  %v3809_v56 = vld [vmem:[#allocation5 + $0x14] sm:$0xf]  ;;  %v2717_v57 = vor.u32 %v3818_v48, %v2714_v49  ;;  %v2680_v59 = vld [vmem:[#allocation5 + $0x18] sm:$0xf] }
  0x51   :  { %641 = vmatpush.bf16.msrb.mxu3 %v2877_v60  ;;  %v2674_v58 = vld [vmem:[#allocation5 + $0x30] sm:$0xf0]  ;;  %v3814_v60 = vld [vmem:[#allocation5 + $0x34] sm:$0xf0]  ;;  %v3810_v61 = vld [vmem:[#allocation5 + $0x1c] sm:$0xf]  ;;  %v2673_v63 = vor.u32 %v3813_v55, %v2672_v54 }
  0x52   :  { %v2682_v62 = vld [vmem:[#allocation5 + $0x38] sm:$0xf0]  ;;  %v2677_v0 = vor.u32 %v3809_v56, %v2674_v58  ;;  %v2681_v1 = vor.u32 %v3814_v60, %v2680_v59  ;;  %v3877_v6 = vld [vmem:[#allocation7 + $0x30] sm:$0xff]  ;;  %v3876_v9 = vld [vmem:[#allocation7 + $0x28] sm:$0xff]  ;;  %vm2643_vm3 = vcmask 7168  }
  0x53   :  { %603 = vmatpush.bf16.msrb.mxu0 %v2833_v2  ;;  %616 = vmatpush.bf16.msrb.mxu1 %v2837_v3  ;;  %v2685_v2 = vor.u32 %v3810_v61, %v2682_v62  ;;  %v3878_v3 = vld [vmem:[#allocation7 + $0x38] sm:$0xff]  ;;  %v3884_v10 = vld [vmem:[#allocation7 + $0x68] sm:$0xff]  ;;  %v3893_v11 = vld [vmem:[#allocation7 + $0xb0] sm:$0xff] }
  0x54   :  { %629 = vmatpush.bf16.msrb.mxu2 %v2841_v4  ;;  %v3886_v4 = vld [vmem:[#allocation7 + $0x78] sm:$0xff]  ;;  %v3901_v12 = vld [vmem:[#allocation7 + $0xf0] sm:$0xff]  ;;  %v3875_v13 = vld [vmem:[#allocation7 + $0x20] sm:$0xff] }
  0x55   :  { %642 = vmatpush.bf16.msrb.mxu3 %v2845_v8  ;;  %v3894_v5 = vld [vmem:[#allocation7 + $0xb8] sm:$0xff]  ;;  %v3885_v8 = vld [vmem:[#allocation7 + $0x70] sm:$0xff]  ;;  %v3891_v19 = vld [vmem:[#allocation7 + $0xa0] sm:$0xff] }
  0x56   :  { %v3902_v7 = vld [vmem:[#allocation7 + $0xf8] sm:$0xff]  ;;  %v3873_v21 = vld [vmem:[#allocation7 + $0x10] sm:$0xff]  ;;  %v3872_v25 = vld [vmem:[#allocation7 + $0x8] sm:$0xff] }
  0x57   :  { %604 = vmatpush.bf16.msrb.mxu0 %v2801_v14  ;;  %617 = vmatpush.bf16.msrb.mxu1 %v2805_v15  ;;  %v3883_v14 = vld [vmem:[#allocation7 + $0x60] sm:$0xff]  ;;  %v3892_v15 = vld [vmem:[#allocation7 + $0xa8] sm:$0xff]  ;;  %v3874_v17 = vld [vmem:[#allocation7 + $0x18] sm:$0xff] }
  0x58   :  { %630 = vmatpush.bf16.msrb.mxu2 %v2809_v16  ;;  %v3900_v16 = vld [vmem:[#allocation7 + $0xe8] sm:$0xff]  ;;  %v3882_v18 = vld [vmem:[#allocation7 + $0x58] sm:$0xff]  ;;  %v3881_v22 = vld [vmem:[#allocation7 + $0x50] sm:$0xff] }
  0x59   :  { %643 = vmatpush.bf16.msrb.mxu3 %v2813_v20  ;;  %v3899_v20 = vld [vmem:[#allocation7 + $0xe0] sm:$0xff]  ;;  %v3890_v23 = vld [vmem:[#allocation7 + $0x98] sm:$0xff]  ;;  %v3896_v33 = vld [vmem:[#allocation7 + $0xc8] sm:$0xff] }
  0x5a   :  { %v3898_v24 = vld [vmem:[#allocation7 + $0xd8] sm:$0xff]  ;;  %v3871_v29 = vld [vmem:[#allocation7] sm:$0xff]  ;;  %v3124_v41 = vld [vmem:[#allocation10 + $0xa8] sm:$0xf] }
  0x5b   :  { %605 = vmatpush.bf16.msrb.mxu0 %v2769_v26  ;;  %618 = vmatpush.bf16.msrb.mxu1 %v2773_v27  ;;  %v3880_v26 = vld [vmem:[#allocation7 + $0x48] sm:$0xff]  ;;  %v3889_v27 = vld [vmem:[#allocation7 + $0x90] sm:$0xff]  ;;  %v3879_v30 = vld [vmem:[#allocation7 + $0x40] sm:$0xff] }
  0x5c   :  { %631 = vmatpush.bf16.msrb.mxu2 %v2777_v28  ;;  %v3897_v28 = vld [vmem:[#allocation7 + $0xd0] sm:$0xff]  ;;  %v3887_v35 = vld [vmem:[#allocation7 + $0x80] sm:$0xff]  ;;  %v3948_v43 = vld [vmem:[#allocation10 + $0xac] sm:$0xf] }
  0x5d   :  { %644 = vmatpush.bf16.msrb.mxu3 %v2781_v32  ;;  %v3888_v32 = vld [vmem:[#allocation7 + $0x88] sm:$0xff]  ;;  %v3895_v36 = vld [vmem:[#allocation7 + $0xc0] sm:$0xff]  ;;  %v3949_v42 = vld [vmem:[#allocation10 + $0xb0] sm:$0xf0] }
  0x5e   :  { %v3125_v45 = vor.u32 %v3949_v42, %v3124_v41  ;;  %v3126_v46 = vld [vmem:[#allocation10 + $0xb4] sm:$0xf0]  ;;  %v3220_v47 = vld [vmem:[#allocation8 + $0xa8] sm:$0xf]  ;;  %v3925_v48 = vld [vmem:[#allocation8 + $0xb0] sm:$0xf0] }
  0x5f   :  { %606 = vmatpush.bf16.msrb.mxu0 %v2737_v38  ;;  %619 = vmatpush.bf16.msrb.mxu1 %v2741_v39  ;;  %v3946_v54 = vld [vmem:[#allocation10 + $0x98] sm:$0xf0]  ;;  %v3945_v55 = vld [vmem:[#allocation10 + $0x94] sm:$0xf]  ;;  %v3208_v58 = vld [vmem:[#allocation8 + $0x90] sm:$0xf] }
  0x60   :  { %632 = vmatpush.bf16.msrb.mxu2 %v2745_v40  ;;  %v3922_v59 = vld [vmem:[#allocation8 + $0x98] sm:$0xf0]  ;;  %v3100_v62 = vld [vmem:[#allocation10 + $0x78] sm:$0xf]  ;;  %v3933_v41 = vld [vmem:[#allocation10 + $0x34] sm:$0xf] }
  0x61   :  { %645 = vmatpush.bf16.msrb.mxu3 %v2749_v44  ;;  %v3209_v61 = vor.u32 %v3922_v59, %v3208_v58 }
  0x63   :  { %607 = vmatpush.bf16.msrb.mxu0 %v2705_v50  ;;  %620 = vmatpush.bf16.msrb.mxu1 %v2709_v51  ;;  %v3129_v50 = vor.u32 %v3948_v43, %v3126_v46  ;;  %v3221_v51 = vor.u32 %v3925_v48, %v3220_v47  ;;  %v3910_v46 = vld [vmem:[#allocation8 + $0x38] sm:$0xf0] }
  0x64   :  { %633 = vmatpush.bf16.msrb.mxu2 %v2713_v52  ;;  %v3112_v52 = vld [vmem:[#allocation10 + $0x90] sm:$0xf] }
  0x65   :  { %646 = vmatpush.bf16.msrb.mxu3 %v2717_v57  ;;  %v3113_v56 = vor.u32 %v3946_v54, %v3112_v52  ;;  %v3114_v57 = vld [vmem:[#allocation10 + $0x9c] sm:$0xf0]  ;;  %v3052_v54 = vld [vmem:[#allocation10 + $0x18] sm:$0xf] }
  0x66   :  { %v3117_v60 = vor.u32 %v3945_v55, %v3114_v57  ;;  %v3931_v55 = vld [vmem:[#allocation10 + $0x20] sm:$0xf0] }
  0x67   :  { %608 = vmatpush.bf16.msrb.mxu0 %v2673_v63  ;;  %621 = vmatpush.bf16.msrb.mxu1 %v2677_v0  ;;  %v3943_v63 = vld [vmem:[#allocation10 + $0x80] sm:$0xf0]  ;;  %v3942_v0 = vld [vmem:[#allocation10 + $0x7c] sm:$0xf]  ;;  %v3053_v58 = vor.u32 %v3931_v55, %v3052_v54  ;;  %v3192_v54 = vld [vmem:[#allocation8 + $0x68] sm:$0xf] }
  0x68   :  { %634 = vmatpush.bf16.msrb.mxu2 %v2681_v1  ;;  %v3102_v1 = vld [vmem:[#allocation10 + $0x84] sm:$0xf0]  ;;  %v3917_v55 = vld [vmem:[#allocation8 + $0x70] sm:$0xf0] }
  0x69   :  { %647 = vmatpush.bf16.msrb.mxu3 %v2685_v2  ;;  %v3196_v2 = vld [vmem:[#allocation8 + $0x78] sm:$0xf] }
  0x6a   :  { %609 = vmatmul.bf16.vlgmr.msrb.gmra.mxu0 %v4434_v53  ;;  %622 = vmatmul.bf16.vlgmr.msrb.gmra.mxu1 %v4434_v53 }
  0x6b   :  { %917 = vmatpush.bf16.msra.mxu0 %v3878_v3  ;;  %930 = vmatpush.bf16.msra.mxu1 %v3886_v4  ;;  %v3919_v3 = vld [vmem:[#allocation8 + $0x80] sm:$0xf0]  ;;  %v3101_v4 = vor.u32 %v3943_v63, %v3100_v62 }
  0x6c   :  { %635 = vmatmul.bf16.vlgmr.msrb.gmra.mxu2 %v4434_v53  ;;  %648 = vmatmul.bf16.vlgmr.msrb.gmra.mxu3 %v4434_v53 }
  0x6d   :  { %943 = vmatpush.bf16.msra.mxu2 %v3894_v5  ;;  %956 = vmatpush.bf16.msra.mxu3 %v3902_v7  ;;  %v3132_v5 = vld [vmem:[#allocation10 + $0xb0] sm:$0xf]  ;;  %v3105_v7 = vor.u32 %v3942_v0, %v3102_v1 }
  0x6f   :  { %918 = vmatpush.bf16.msra.mxu0 %v3877_v6  ;;  %931 = vmatpush.bf16.msra.mxu1 %v3885_v8  ;;  %v3950_v6 = vld [vmem:[#allocation10 + $0xb8] sm:$0xf0]  ;;  %v3197_v8 = vor.u32 %v3919_v3, %v3196_v2 }
  0x71   :  { %944 = vmatpush.bf16.msra.mxu2 %v3893_v11  ;;  %957 = vmatpush.bf16.msra.mxu3 %v3901_v12  ;;  %v3939_v11 = vld [vmem:[#allocation10 + $0x64] sm:$0xf]  ;;  %v3133_v12 = vor.u32 %v3950_v6, %v3132_v5  ;;  %v3941_v5 = vld [vmem:[#allocation10 + $0x70] sm:$0xf0] }
  0x73   :  { %919 = vmatpush.bf16.msra.mxu0 %v3876_v9  ;;  %932 = vmatpush.bf16.msra.mxu1 %v3884_v10  ;;  %v3088_v9 = vld [vmem:[#allocation10 + $0x60] sm:$0xf]  ;;  %v3940_v10 = vld [vmem:[#allocation10 + $0x68] sm:$0xf0] }
  0x75   :  { %945 = vmatpush.bf16.msra.mxu2 %v3892_v15  ;;  %958 = vmatpush.bf16.msra.mxu3 %v3900_v16  ;;  %v3916_v15 = vld [vmem:[#allocation8 + $0x68] sm:$0xf0]  ;;  %v3120_v16 = vld [vmem:[#allocation10 + $0x98] sm:$0xf] }
  0x77   :  { %920 = vmatpush.bf16.msra.mxu0 %v3875_v13  ;;  %933 = vmatpush.bf16.msra.mxu1 %v3883_v14  ;;  %v3090_v13 = vld [vmem:[#allocation10 + $0x6c] sm:$0xf0]  ;;  %v3184_v14 = vld [vmem:[#allocation8 + $0x60] sm:$0xf] }
  0x79   :  { %946 = vmatpush.bf16.msra.mxu2 %v3891_v19  ;;  %959 = vmatpush.bf16.msra.mxu3 %v3899_v20  ;;  %v3076_v19 = vld [vmem:[#allocation10 + $0x48] sm:$0xf]  ;;  %v3937_v20 = vld [vmem:[#allocation10 + $0x50] sm:$0xf0] }
  0x7b   :  { %921 = vmatpush.bf16.msra.mxu0 %v3874_v17  ;;  %934 = vmatpush.bf16.msra.mxu1 %v3882_v18  ;;  %v3947_v17 = vld [vmem:[#allocation10 + $0xa0] sm:$0xf0]  ;;  %v3089_v18 = vor.u32 %v3940_v10, %v3088_v9  ;;  %v3040_v9 = vld [vmem:[#allocation10] sm:$0xf]  ;;  %v3928_v10 = vld [vmem:[#allocation10 + $0x8] sm:$0xf0] }
  0x7d   :  { %947 = vmatpush.bf16.msra.mxu2 %v3890_v23  ;;  %960 = vmatpush.bf16.msra.mxu3 %v3898_v24  ;;  %v3185_v23 = vor.u32 %v3916_v15, %v3184_v14  ;;  %v3936_v24 = vld [vmem:[#allocation10 + $0x4c] sm:$0xf]  ;;  %v3938_v14 = vld [vmem:[#allocation10 + $0x58] sm:$0xf0] }
  0x7f   :  { %922 = vmatpush.bf16.msra.mxu0 %v3873_v21  ;;  %935 = vmatpush.bf16.msra.mxu1 %v3881_v22  ;;  %v3121_v21 = vor.u32 %v3947_v17, %v3120_v16  ;;  %v3093_v22 = vor.u32 %v3939_v11, %v3090_v13  ;;  %v3927_v11 = vld [vmem:[#allocation10 + $0x4] sm:$0xf]  ;;  %v3084_v13 = vld [vmem:[#allocation10 + $0x50] sm:$0xf]  ;;  %v3924_v17 = vld [vmem:[#allocation8 + $0xac] sm:$0xf] }
  0x80   :  { %v3085_v16 = vor.u32 %v3938_v14, %v3084_v13 }
  0x81   :  { %948 = vmatpush.bf16.msra.mxu2 %v3889_v27  ;;  %961 = vmatpush.bf16.msra.mxu3 %v3897_v28  ;;  %v3172_v27 = vld [vmem:[#allocation8 + $0x48] sm:$0xf]  ;;  %v3913_v28 = vld [vmem:[#allocation8 + $0x50] sm:$0xf0] }
  0x83   :  { %923 = vmatpush.bf16.msra.mxu0 %v3872_v25  ;;  %936 = vmatpush.bf16.msra.mxu1 %v3880_v26  ;;  %v3078_v25 = vld [vmem:[#allocation10 + $0x54] sm:$0xf0]  ;;  %v3108_v26 = vld [vmem:[#allocation10 + $0x80] sm:$0xf] }
  0x85   :  { %949 = vmatpush.bf16.msra.mxu2 %v3888_v32  ;;  %962 = vmatpush.bf16.msra.mxu3 %v3896_v33  ;;  %v3077_v32 = vor.u32 %v3937_v20, %v3076_v19  ;;  %v3228_v19 = vld [vmem:[#allocation8 + $0xb0] sm:$0xf] }
  0x87   :  { %924 = vmatpush.bf16.msra.mxu0 %v3871_v29  ;;  %937 = vmatpush.bf16.msra.mxu1 %v3879_v30  ;;  %v3944_v29 = vld [vmem:[#allocation10 + $0x88] sm:$0xf0] }
  0x88   :  { %v3109_v30 = vor.u32 %v3944_v29, %v3108_v26  ;;  %v3072_v26 = vld [vmem:[#allocation10 + $0x38] sm:$0xf] }
  0x89   :  { %950 = vmatpush.bf16.msra.mxu2 %v3887_v35  ;;  %963 = vmatpush.bf16.msra.mxu3 %v3895_v36  ;;  %v3081_v35 = vor.u32 %v3936_v24, %v3078_v25  ;;  %v3173_v36 = vor.u32 %v3913_v28, %v3172_v27  ;;  %v3935_v27 = vld [vmem:[#allocation10 + $0x40] sm:$0xf0]  ;;  %v3921_v28 = vld [vmem:[#allocation8 + $0x94] sm:$0xf] }
  0x8a   :  { %v3073_v29 = vor.u32 %v3935_v27, %v3072_v26  ;;  %v3280_v27 = vld [vmem:[#allocation11 + $0x60] sm:$0xf] }
  0x8b   :  { %1162 = vmatpush.bf16.msrb.mxu0 %v3125_v45  ;;  %1175 = vmatpush.bf16.msrb.mxu1 %v3129_v50  ;;  %v3160_v45 = vld [vmem:[#allocation8 + $0x30] sm:$0xf] }
  0x8c   :  { %v3161_v52 = vor.u32 %v3910_v46, %v3160_v45  ;;  %v3920_v45 = vld [vmem:[#allocation8 + $0x88] sm:$0xf0] }
  0x8d   :  { %1329 = vmatpush.bf16.msrb.mxu3 %v3221_v51  ;;  %1188 = vmatpush.bf16.msrb.mxu2 %v3133_v12  ;;  %v3042_v12 = vld [vmem:[#allocation10 + $0xc] sm:$0xf0] }
  0x8e   :  { %v3045_v15 = vor.u32 %v3927_v11, %v3042_v12  ;;  %v3144_v11 = vld [vmem:[#allocation8 + $0x8] sm:$0xf] }
  0x8f   :  { %1163 = vmatpush.bf16.msrb.mxu0 %v3113_v56  ;;  %1176 = vmatpush.bf16.msrb.mxu1 %v3117_v60  ;;  %v3930_v56 = vld [vmem:[#allocation10 + $0x1c] sm:$0xf] }
  0x91   :  { %1330 = vmatpush.bf16.msrb.mxu3 %v3209_v61  ;;  %1189 = vmatpush.bf16.msrb.mxu2 %v3121_v21  ;;  %v3926_v21 = vld [vmem:[#allocation8 + $0xb8] sm:$0xf0] }
  0x92   :  { %v3229_v24 = vor.u32 %v3926_v21, %v3228_v19 }
  0x93   :  { %1164 = vmatpush.bf16.msrb.mxu0 %v3101_v4  ;;  %1177 = vmatpush.bf16.msrb.mxu1 %v3105_v7  ;;  %v3096_v4 = vld [vmem:[#allocation10 + $0x68] sm:$0xf]  ;;  %v3907_v7 = vld [vmem:[#allocation8 + $0x20] sm:$0xf0] }
  0x94   :  { %v3097_v6 = vor.u32 %v3941_v5, %v3096_v4  ;;  %v3906_v4 = vld [vmem:[#allocation8 + $0x1c] sm:$0xf]  ;;  %v3150_v5 = vld [vmem:[#allocation8 + $0x24] sm:$0xf0] }
  0x95   :  { %1331 = vmatpush.bf16.msrb.mxu3 %v3197_v8  ;;  %1190 = vmatpush.bf16.msrb.mxu2 %v3109_v30  ;;  %v3210_v30 = vld [vmem:[#allocation8 + $0x9c] sm:$0xf0] }
  0x97   :  { %1165 = vmatpush.bf16.msrb.mxu0 %v3089_v18  ;;  %1178 = vmatpush.bf16.msrb.mxu1 %v3093_v22  ;;  %v3222_v18 = vld [vmem:[#allocation8 + $0xb4] sm:$0xf0]  ;;  %v3136_v22 = vld [vmem:[#allocation8] sm:$0xf] }
  0x98   :  { %v3225_v20 = vor.u32 %v3924_v17, %v3222_v18  ;;  %v3973_v17 = vld [vmem:[#allocation11 + $0xb0] sm:$0xf0]  ;;  %v3304_v18 = vld [vmem:[#allocation11 + $0x90] sm:$0xf] }
  0x99   :  { %1332 = vmatpush.bf16.msrb.mxu3 %v3185_v23  ;;  %1191 = vmatpush.bf16.msrb.mxu2 %v3097_v6  ;;  %v3904_v23 = vld [vmem:[#allocation8 + $0x8] sm:$0xf0]  ;;  %v3156_v6 = vld [vmem:[#allocation8 + $0x20] sm:$0xf] }
  0x9a   :  { %v3137_v25 = vor.u32 %v3904_v23, %v3136_v22  ;;  %v3292_v23 = vld [vmem:[#allocation11 + $0x78] sm:$0xf] }
  0x9b   :  { %1166 = vmatpush.bf16.msrb.mxu0 %v3077_v32  ;;  %1179 = vmatpush.bf16.msrb.mxu1 %v3081_v35  ;;  %v3216_v32 = vld [vmem:[#allocation8 + $0x98] sm:$0xf]  ;;  %v3213_v35 = vor.u32 %v3921_v28, %v3210_v30  ;;  %v3412_v30 = vld [vmem:[#allocation11 + $0x168] sm:$0xf] }
  0x9d   :  { %1333 = vmatpush.bf16.msrb.mxu3 %v3173_v36  ;;  %1192 = vmatpush.bf16.msrb.mxu2 %v3085_v16  ;;  %v3316_v16 = vld [vmem:[#allocation11 + $0xa8] sm:$0xf] }
  0x9e   :  { %v3317_v19 = vor.u32 %v3973_v17, %v3316_v16  ;;  %v3472_v16 = vld [vmem:[#allocation11 + $0x1e0] sm:$0xf]  ;;  %v4012_v17 = vld [vmem:[#allocation11 + $0x1e8] sm:$0xf0] }
  0xa1   :  { %1334 = vmatpush.bf16.msrb.mxu3 %v3161_v52  ;;  %1193 = vmatpush.bf16.msrb.mxu2 %v3073_v29  ;;  %v3186_v52 = vld [vmem:[#allocation8 + $0x6c] sm:$0xf0]  ;;  %v3964_v29 = vld [vmem:[#allocation11 + $0x68] sm:$0xf0] }
  0xc7   :  { %v4444_v31 = vpop.f32.mrf.mxu0  ;;  %v4446_v34 = vpop.f32.mrf.mxu1 }
  0xcf   :  { %v4450_v38 = vpop.f32.mrf.mxu3  ;;  %v560_v39 = vpop.f32.mrf.mxu0 }
  0xd0   :  { %v4448_v37 = vpop.f32.mrf.mxu2  ;;  %v573_v40 = vpop.f32.mrf.mxu1  ;;  %v3064_v39 = vld [vmem:[#allocation10 + $0x30] sm:$0xf] }
  0xd1   :  { %v3934_v40 = vld [vmem:[#allocation10 + $0x38] sm:$0xf0] }
  0xd7   :  { %v599_v49 = vpop.f32.mrf.mxu3 }
  0xd8   :  { %v586_v44 = vpop.f32.mrf.mxu2  ;;  %v3065_v49 = vor.u32 %v3934_v40, %v3064_v39  ;;  %v3060_v39 = vld [vmem:[#allocation10 + $0x20] sm:$0xf]  ;;  %v3932_v40 = vld [vmem:[#allocation10 + $0x28] sm:$0xf0] }
  0xd9   :  { %v3066_v44 = vld [vmem:[#allocation10 + $0x3c] sm:$0xf0] }
  0xda   :  { %v3069_v51 = vor.u32 %v3933_v41, %v3066_v44  ;;  %1167 = vmatpush.bf16.msrb.mxu0 %v3065_v49  ;;  %v3918_v41 = vld [vmem:[#allocation8 + $0x7c] sm:$0xf]  ;;  %v3204_v44 = vld [vmem:[#allocation8 + $0x80] sm:$0xf]  ;;  %v3929_v49 = vld [vmem:[#allocation10 + $0x10] sm:$0xf0] }
  0xdc   :  { %1180 = vmatpush.bf16.msrb.mxu1 %v3069_v51 }
  0xde   :  { %1168 = vmatpush.bf16.msrb.mxu0 %v3053_v58  ;;  %v3174_v58 = vld [vmem:[#allocation8 + $0x54] sm:$0xf0] }
  0xe7   :  { %v610_v33 = vpop.f32.mrf.mxu0  ;;  %v623_v43 = vpop.f32.mrf.mxu1 }
  0xe8   :  { %v653_v42 = vmul.f32 %v610_v33, %v4444_v31  ;;  %v654_v47 = vmul.f32 %v623_v43, %v4446_v34  ;;  %v3054_v31 = vld [vmem:[#allocation10 + $0x24] sm:$0xf0]  ;;  %v3923_v33 = vld [vmem:[#allocation8 + $0xa0] sm:$0xf0] }
  0xe9   :  { %v3057_v61 = vor.u32 %v3930_v56, %v3054_v31  ;;  %v3217_v36 = vor.u32 %v3923_v33, %v3216_v32  ;;  %v3198_v43 = vld [vmem:[#allocation8 + $0x84] sm:$0xf0]  ;;  %v3193_v31 = vor.u32 %v3917_v55, %v3192_v54  ;;  %v3997_v32 = vld [vmem:[#allocation11 + $0x170] sm:$0xf0]  ;;  %v3991_v54 = vld [vmem:[#allocation11 + $0x140] sm:$0xf0] }
  0xea   :  { %v657_v48 = vpack.c.bf16 %v653_v42, %v653_v42  ;;  %v658_v50 = vpack.c.bf16 %v654_v47, %v654_v47  ;;  %v3061_v42 = vor.u32 %v3932_v40, %v3060_v39  ;;  %v3201_v46 = vor.u32 %v3918_v41, %v3198_v43  ;;  %v3972_v40 = vld [vmem:[#allocation11 + $0xac] sm:$0xf]  ;;  %v3318_v41 = vld [vmem:[#allocation11 + $0xb4] sm:$0xf0] }
  0xeb   :  { %1181 = vmatpush.bf16.msrb.mxu1 %v3057_v61  ;;  %v3205_v47 = vor.u32 %v3920_v45, %v3204_v44  ;;  %v3281_v43 = vor.u32 %v3964_v29, %v3280_v27  ;;  %v3508_v44 = vld [vmem:[#allocation11 + $0x228] sm:$0xf]  ;;  %v4021_v45 = vld [vmem:[#allocation11 + $0x230] sm:$0xf0] }
  0xec   :  { %925 = vmatmul.bf16.vlgmr.msra.gmra.mxu0 %v657_v48  ;;  %938 = vmatmul.bf16.vlgmr.msra.gmra.mxu1 %v658_v50  ;;  %v3048_v48 = vld [vmem:[#allocation10 + $0x8] sm:$0xf]  ;;  %v3915_v50 = vld [vmem:[#allocation8 + $0x64] sm:$0xf]  ;;  %v3957_v29 = vld [vmem:[#allocation11 + $0x34] sm:$0xf] }
  0xed   :  { %1194 = vmatpush.bf16.msrb.mxu2 %v3061_v42  ;;  %v3049_v51 = vor.u32 %v3929_v49, %v3048_v48  ;;  %v3189_v56 = vor.u32 %v3915_v50, %v3186_v52  ;;  %v3400_v42 = vld [vmem:[#allocation11 + $0x150] sm:$0xf]  ;;  %v3268_v48 = vld [vmem:[#allocation11 + $0x48] sm:$0xf]  ;;  %v3961_v49 = vld [vmem:[#allocation11 + $0x50] sm:$0xf0] }
  0xee   :  { %v3388_v52 = vld [vmem:[#allocation11 + $0x138] sm:$0xf] }
  0xef   :  { %v636_v57 = vpop.f32.mrf.mxu2  ;;  %v649_v59 = vpop.f32.mrf.mxu3  ;;  %1182 = vmatpush.bf16.msrb.mxu1 %v3045_v15 }
  0xf0   :  { %v655_v34 = vmul.f32 %v636_v57, %v4448_v37  ;;  %v612_v60 = vpop.f32.mrf.mxu0  ;;  %v656_v62 = vmul.f32 %v649_v59, %v4450_v38  ;;  %v625_v63 = vpop.f32.mrf.mxu1  ;;  %v3148_v37 = vld [vmem:[#allocation8 + $0x18] sm:$0xf]  ;;  %v3041_v38 = vor.u32 %v3928_v10, %v3040_v9  ;;  %v3912_v57 = vld [vmem:[#allocation8 + $0x4c] sm:$0xf]  ;;  %v3903_v9 = vld [vmem:[#allocation8 + $0x4] sm:$0xf] }
  0xf1   :  { %v3149_v8 = vor.u32 %v3907_v7, %v3148_v37  ;;  %1195 = vmatpush.bf16.msrb.mxu2 %v3049_v51  ;;  %v3177_v59 = vor.u32 %v3912_v57, %v3174_v58  ;;  %v3914_v60 = vld [vmem:[#allocation8 + $0x58] sm:$0xf0]  ;;  %v3162_v63 = vld [vmem:[#allocation8 + $0x3c] sm:$0xf0]  ;;  %v3908_v37 = vld [vmem:[#allocation8 + $0x28] sm:$0xf0]  ;;  %v3153_v7 = vor.u32 %v3906_v4, %v3150_v5  ;;  %v3321_v51 = vor.u32 %v3972_v40, %v3318_v41 }
  0xf2   :  { %v659_v0 = vpack.c.bf16 %v655_v34, %v655_v34  ;;  %v660_v1 = vpack.c.bf16 %v656_v62, %v656_v62  ;;  %1169 = vmatpush.bf16.msrb.mxu0 %v3041_v38  ;;  %v3180_v34 = vld [vmem:[#allocation8 + $0x50] sm:$0xf]  ;;  %v3909_v62 = vld [vmem:[#allocation8 + $0x34] sm:$0xf]  ;;  %v3509_v57 = vor.u32 %v4021_v45, %v3508_v44  ;;  %v3269_v58 = vor.u32 %v3961_v49, %v3268_v48  ;;  %v3966_v4 = vld [vmem:[#allocation11 + $0x7c] sm:$0xf] }
  0xf3   :  { %1335 = vmatpush.bf16.msrb.mxu3 %v3149_v8  ;;  %1355 = vmatpush.bf16.msra.mxu1 %v3229_v24  ;;  %v3181_v61 = vor.u32 %v3914_v60, %v3180_v34  ;;  %v3157_v8 = vor.u32 %v3908_v37, %v3156_v6  ;;  %v3138_v10 = vld [vmem:[#allocation8 + $0xc] sm:$0xf0]  ;;  %v3905_v38 = vld [vmem:[#allocation8 + $0x10] sm:$0xf0]  ;;  %v3967_v24 = vld [vmem:[#allocation11 + $0x80] sm:$0xf0] }
  0xf4   :  { %951 = vmatmul.bf16.vlgmr.msra.gmra.mxu2 %v659_v0  ;;  %964 = vmatmul.bf16.vlgmr.msra.gmra.mxu3 %v660_v1  ;;  %v3168_v0 = vld [vmem:[#allocation8 + $0x38] sm:$0xf]  ;;  %v3165_v1 = vor.u32 %v3909_v62, %v3162_v63  ;;  %v3141_v12 = vor.u32 %v3903_v9, %v3138_v10  ;;  %v3145_v14 = vor.u32 %v3905_v38, %v3144_v11  ;;  %v3256_v34 = vld [vmem:[#allocation11 + $0x30] sm:$0xf]  ;;  %v4018_v60 = vld [vmem:[#allocation11 + $0x218] sm:$0xf0] }
  0xf5   :  { %1873 = vmatpush.bf16.msra.mxu2 %v3317_v19  ;;  %v3293_v26 = vor.u32 %v3967_v24, %v3292_v23  ;;  %v3958_v62 = vld [vmem:[#allocation11 + $0x38] sm:$0xf0]  ;;  %v3376_v63 = vld [vmem:[#allocation11 + $0x120] sm:$0xf]  ;;  %v3294_v5 = vld [vmem:[#allocation11 + $0x84] sm:$0xf0] }
  0xf6   :  { %1342 = vmatpush.bf16.msra.mxu0 %v3225_v20  ;;  %v3970_v20 = vld [vmem:[#allocation11 + $0x98] sm:$0xf0]  ;;  %v3257_v37 = vor.u32 %v3958_v62, %v3256_v34  ;;  %v3244_v10 = vld [vmem:[#allocation11 + $0x18] sm:$0xf]  ;;  %v3955_v11 = vld [vmem:[#allocation11 + $0x20] sm:$0xf0]  ;;  %v3297_v38 = vor.u32 %v3966_v4, %v3294_v5 }
  0xf7   :  { %v638_v2 = vpop.f32.mrf.mxu2  ;;  %v651_v3 = vpop.f32.mrf.mxu3  ;;  %1336 = vmatpush.bf16.msrb.mxu3 %v3137_v25  ;;  %1356 = vmatpush.bf16.msra.mxu1 %v3217_v36  ;;  %v3305_v21 = vor.u32 %v3970_v20, %v3304_v18  ;;  %v3232_v18 = vld [vmem:[#allocation11] sm:$0xf]  ;;  %v3952_v19 = vld [vmem:[#allocation11 + $0x8] sm:$0xf0]  ;;  %v3414_v24 = vld [vmem:[#allocation11 + $0x174] sm:$0xf0] }
  0xf8   :  { %v3911_v2 = vld [vmem:[#allocation8 + $0x40] sm:$0xf0]  ;;  %v3996_v23 = vld [vmem:[#allocation11 + $0x16c] sm:$0xf]  ;;  %v3246_v40 = vld [vmem:[#allocation11 + $0x24] sm:$0xf0] }
  0xf9   :  { %v3169_v3 = vor.u32 %v3911_v2, %v3168_v0  ;;  %1874 = vmatpush.bf16.msra.mxu2 %v3305_v21  ;;  %v3988_v0 = vld [vmem:[#allocation11 + $0x128] sm:$0xf0]  ;;  %v3990_v41 = vld [vmem:[#allocation11 + $0x13c] sm:$0xf]  ;;  %v3951_v45 = vld [vmem:[#allocation11 + $0x4] sm:$0xf] }
  0xfa   :  { %1343 = vmatpush.bf16.msra.mxu0 %v3213_v35  ;;  %v3413_v35 = vor.u32 %v3997_v32, %v3412_v30  ;;  %v3377_v9 = vor.u32 %v3988_v0, %v3376_v63  ;;  %v3960_v21 = vld [vmem:[#allocation11 + $0x4c] sm:$0xf]  ;;  %v3258_v30 = vld [vmem:[#allocation11 + $0x3c] sm:$0xf0]  ;;  %v3993_v32 = vld [vmem:[#allocation11 + $0x154] sm:$0xf] }
  0xfb   :  { %1357 = vmatpush.bf16.msra.mxu1 %v3205_v47  ;;  %v3378_v48 = vld [vmem:[#allocation11 + $0x12c] sm:$0xf0]  ;;  %v3366_v34 = vld [vmem:[#allocation11 + $0x114] sm:$0xf0]  ;;  %v3995_v62 = vld [vmem:[#allocation11 + $0x160] sm:$0xf0] }
  0xfc   :  { %1886 = vmatpush.bf16.msra.mxu3 %v3413_v35  ;;  %v3261_v35 = vor.u32 %v3957_v29, %v3258_v30  ;;  %v3420_v49 = vld [vmem:[#allocation11 + $0x170] sm:$0xf]  ;;  %v4006_v5 = vld [vmem:[#allocation11 + $0x1b8] sm:$0xf0]  ;;  %v3975_v29 = vld [vmem:[#allocation11 + $0xc4] sm:$0xf] }
  0xfd   :  { %1875 = vmatpush.bf16.msra.mxu2 %v3293_v26  ;;  %v3233_v26 = vor.u32 %v3952_v19, %v3232_v18  ;;  %v3330_v30 = vld [vmem:[#allocation11 + $0xcc] sm:$0xf0] }
  0xfe   :  { %1344 = vmatpush.bf16.msra.mxu0 %v3201_v46  ;;  %v3994_v46 = vld [vmem:[#allocation11 + $0x158] sm:$0xf0] }
  0xff   :  { %1358 = vmatpush.bf16.msra.mxu1 %v3193_v31  ;;  %v3401_v50 = vor.u32 %v3994_v46, %v3400_v42  ;;  %v3306_v31 = vld [vmem:[#allocation11 + $0x9c] sm:$0xf0]  ;;  %v3390_v42 = vld [vmem:[#allocation11 + $0x144] sm:$0xf0]  ;;  %v3234_v46 = vld [vmem:[#allocation11 + $0xc] sm:$0xf0] }
 0x100   :  { %v3393_v44 = vor.u32 %v3990_v41, %v3390_v42  ;;  %v3974_v41 = vld [vmem:[#allocation11 + $0xb8] sm:$0xf0]  ;;  %v3372_v42 = vld [vmem:[#allocation11 + $0x110] sm:$0xf] }
 0x101   :  { %1876 = vmatpush.bf16.msra.mxu2 %v3281_v43  ;;  %1887 = vmatpush.bf16.msra.mxu3 %v3401_v50  ;;  %v3998_v50 = vld [vmem:[#allocation11 + $0x178] sm:$0xf0] }
 0x102   :  { %1345 = vmatpush.bf16.msra.mxu0 %v3189_v56  ;;  %v3969_v56 = vld [vmem:[#allocation11 + $0x94] sm:$0xf] }
 0x103   :  { %1359 = vmatpush.bf16.msra.mxu1 %v3181_v61  ;;  %v3389_v61 = vor.u32 %v3991_v54, %v3388_v52  ;;  %v3309_v2 = vor.u32 %v3969_v56, %v3306_v31  ;;  %v3421_v52 = vor.u32 %v3998_v50, %v3420_v49  ;;  %v3364_v54 = vld [vmem:[#allocation11 + $0x108] sm:$0xf]  ;;  %v3971_v50 = vld [vmem:[#allocation11 + $0xa0] sm:$0xf0] }
 0x104   :  { %1337 = vmatmul.bf16.vlgmr.msrb.gmra.mxu3 %v4434_v53  ;;  %v3460_v56 = vld [vmem:[#allocation11 + $0x1c8] sm:$0xf] }
 0x105   :  { %1877 = vmatpush.bf16.msra.mxu2 %v3269_v58  ;;  %1888 = vmatpush.bf16.msra.mxu3 %v3389_v61  ;;  %v3984_v58 = vld [vmem:[#allocation11 + $0x10c] sm:$0xf]  ;;  %v3408_v61 = vld [vmem:[#allocation11 + $0x158] sm:$0xf] }
 0x106   :  { %1346 = vmatpush.bf16.msra.mxu0 %v3177_v59  ;;  %v3496_v59 = vld [vmem:[#allocation11 + $0x210] sm:$0xf]  ;;  %v3409_v63 = vor.u32 %v3995_v62, %v3408_v61  ;;  %v4011_v62 = vld [vmem:[#allocation11 + $0x1e4] sm:$0xf] }
 0x107   :  { %1360 = vmatpush.bf16.msra.mxu1 %v3169_v3  ;;  %v3497_v6 = vor.u32 %v4018_v60, %v3496_v59  ;;  %v3369_v60 = vor.u32 %v3984_v58, %v3366_v34  ;;  %v3968_v58 = vld [vmem:[#allocation11 + $0x88] sm:$0xf0]  ;;  %v3348_v34 = vld [vmem:[#allocation11 + $0xe0] sm:$0xf] }
 0x109   :  { %1878 = vmatpush.bf16.msra.mxu2 %v3257_v37  ;;  %1889 = vmatpush.bf16.msra.mxu3 %v3377_v9  ;;  %v3354_v37 = vld [vmem:[#allocation11 + $0xfc] sm:$0xf0] }
 0x10a   :  { %1347 = vmatpush.bf16.msra.mxu0 %v3165_v1  ;;  %v3396_v9 = vld [vmem:[#allocation11 + $0x140] sm:$0xf] }
 0x10b   :  { %1361 = vmatpush.bf16.msra.mxu1 %v3157_v8  ;;  %v4015_v8 = vld [vmem:[#allocation11 + $0x200] sm:$0xf0] }
 0x10e   :  { %1348 = vmatpush.bf16.msra.mxu0 %v3153_v7  ;;  %v3484_v7 = vld [vmem:[#allocation11 + $0x1f8] sm:$0xf] }
 0x10f   :  { %1362 = vmatpush.bf16.msra.mxu1 %v3145_v14  ;;  %v3485_v14 = vor.u32 %v4015_v8, %v3484_v7 }
 0x112   :  { %1349 = vmatpush.bf16.msra.mxu0 %v3141_v12  ;;  %v3963_v12 = vld [vmem:[#allocation11 + $0x64] sm:$0xf] }
 0x169   :  { %v926_v13 = vpop.f32.mrf.mxu0  ;;  %v939_v15 = vpop.f32.mrf.mxu1 }
 0x16a   :  { %v940_v28 = vadd.f32 %v939_v15, %v926_v13  ;;  %v3282_v13 = vld [vmem:[#allocation11 + $0x6c] sm:$0xf0]  ;;  %v3245_v15 = vor.u32 %v3955_v11, %v3244_v10  ;;  %v3992_v10 = vld [vmem:[#allocation11 + $0x148] sm:$0xf0] }
 0x16b   :  { %v3285_v20 = vor.u32 %v3963_v12, %v3282_v13  ;;  %v3397_v11 = vor.u32 %v3992_v10, %v3396_v9  ;;  %v3979_v12 = vld [vmem:[#allocation11 + $0xe0] sm:$0xf0]  ;;  %v3436_v13 = vld [vmem:[#allocation11 + $0x198] sm:$0xf]  ;;  %v3276_v9 = vld [vmem:[#allocation11 + $0x50] sm:$0xf] }
 0x16c   :  { %1879 = vmatpush.bf16.msra.mxu2 %v3245_v15  ;;  %v4003_v15 = vld [vmem:[#allocation11 + $0x1a0] sm:$0xf0] }
 0x16d   :  { %v3437_v19 = vor.u32 %v4003_v15, %v3436_v13  ;;  %v4005_v13 = vld [vmem:[#allocation11 + $0x1b4] sm:$0xf]  ;;  %v3264_v15 = vld [vmem:[#allocation11 + $0x38] sm:$0xf] }
 0x170   :  { %1880 = vmatpush.bf16.msra.mxu2 %v3233_v26  ;;  %v3424_v26 = vld [vmem:[#allocation11 + $0x180] sm:$0xf] }
 0x171   :  { %v928_v22 = vpop.f32.mrf.mxu0  ;;  %v941_v25 = vpop.f32.mrf.mxu1 }
 0x172   :  { %v3270_v22 = vld [vmem:[#allocation11 + $0x54] sm:$0xf0]  ;;  %v3473_v25 = vor.u32 %v4012_v17, %v3472_v16  ;;  %v3978_v16 = vld [vmem:[#allocation11 + $0xdc] sm:$0xf]  ;;  %v3342_v17 = vld [vmem:[#allocation11 + $0xe4] sm:$0xf0] }
 0x173   :  { %v3273_v27 = vor.u32 %v3960_v21, %v3270_v22  ;;  %v3384_v21 = vld [vmem:[#allocation11 + $0x128] sm:$0xf]  ;;  %v3989_v22 = vld [vmem:[#allocation11 + $0x130] sm:$0xf0] }
 0x177   :  { %v952_v33 = vpop.f32.mrf.mxu2  ;;  %v965_v39 = vpop.f32.mrf.mxu3 }
 0x178   :  { %v953_v36 = vadd.f32 %v952_v33, %v940_v28  ;;  %v3417_v28 = vor.u32 %v3996_v23, %v3414_v24  ;;  %v3402_v33 = vld [vmem:[#allocation11 + $0x15c] sm:$0xf0]  ;;  %v3385_v23 = vor.u32 %v3989_v22, %v3384_v21  ;;  %v3438_v21 = vld [vmem:[#allocation11 + $0x1a4] sm:$0xf0] }
 0x179   :  { %v3328_v24 = vld [vmem:[#allocation11 + $0xc0] sm:$0xf] }
 0x17a   :  { %v966_v47 = vadd.f32 %v965_v39, %v953_v36  ;;  %v3405_v36 = vor.u32 %v3993_v32, %v3402_v33  ;;  %v3954_v39 = vld [vmem:[#allocation11 + $0x1c] sm:$0xf]  ;;  %v3333_v33 = vor.u32 %v3975_v29, %v3330_v30  ;;  %v3252_v22 = vld [vmem:[#allocation11 + $0x20] sm:$0xf]  ;;  %v3516_v29 = vld [vmem:[#allocation11 + $0x230] sm:$0xf] }
 0x17b   :  { %v3249_v43 = vor.u32 %v3954_v39, %v3246_v40  ;;  %v3324_v39 = vld [vmem:[#allocation11 + $0xb0] sm:$0xf]  ;;  %v4022_v30 = vld [vmem:[#allocation11 + $0x238] sm:$0xf0] }
 0x17c   :  { %v1001_v55 = vpack.c.bf16 %v966_v47, %v966_v47  ;;  %v3987_v47 = vld [vmem:[#allocation11 + $0x124] sm:$0xf] }
 0x17e   :  { %1170 = vmatmul.bf16.vlgmr.msrb.gmra.mxu0 %v1001_v55  ;;  %1183 = vmatmul.bf16.vlgmr.msrb.gmra.mxu1 %v1001_v55 }
 0x17f   :  { %1196 = vmatmul.bf16.vlgmr.msrb.gmra.mxu2 %v1001_v55  ;;  %v954_v1 = vpop.f32.mrf.mxu2  ;;  %1912 = vmatpush.bf16.msrb.mxu1 %v3321_v51  ;;  %v967_v3 = vpop.f32.mrf.mxu3  ;;  %v3381_v51 = vor.u32 %v3987_v47, %v3378_v48  ;;  %v3985_v55 = vld [vmem:[#allocation11 + $0x110] sm:$0xf0]  ;;  %v3498_v47 = vld [vmem:[#allocation11 + $0x21c] sm:$0xf0]  ;;  %v3312_v48 = vld [vmem:[#allocation11 + $0x98] sm:$0xf] }
 0x180   :  { %1899 = vmatpush.bf16.msrb.mxu0 %v3509_v57  ;;  %1925 = vmatpush.bf16.msrb.mxu2 %v3417_v28  ;;  %v3365_v31 = vor.u32 %v3985_v55, %v3364_v54  ;;  %v4009_v57 = vld [vmem:[#allocation11 + $0x1d0] sm:$0xf0]  ;;  %v3352_v1 = vld [vmem:[#allocation11 + $0xf0] sm:$0xf]  ;;  %v4000_v28 = vld [vmem:[#allocation11 + $0x188] sm:$0xf0] }
 0x181   :  { %v3461_v59 = vor.u32 %v4009_v57, %v3460_v56  ;;  %v3448_v3 = vld [vmem:[#allocation11 + $0x1b0] sm:$0xf]  ;;  %v3425_v32 = vor.u32 %v4000_v28, %v3424_v26  ;;  %v4014_v55 = vld [vmem:[#allocation11 + $0x1fc] sm:$0xf]  ;;  %v3486_v56 = vld [vmem:[#allocation11 + $0x204] sm:$0xf0] }
 0x182   :  { %1890 = vmatpush.bf16.msra.mxu3 %v3365_v31  ;;  %v3449_v7 = vor.u32 %v4006_v5, %v3448_v3  ;;  %v3300_v31 = vld [vmem:[#allocation11 + $0x80] sm:$0xf]  ;;  %v3489_v57 = vor.u32 %v4014_v55, %v3486_v56  ;;  %v3965_v3 = vld [vmem:[#allocation11 + $0x70] sm:$0xf0]  ;;  %v3956_v26 = vld [vmem:[#allocation11 + $0x28] sm:$0xf0] }
 0x183   :  { %1913 = vmatpush.bf16.msrb.mxu1 %v3309_v2  ;;  %v3982_v2 = vld [vmem:[#allocation11 + $0xf8] sm:$0xf0]  ;;  %v3977_v5 = vld [vmem:[#allocation11 + $0xd0] sm:$0xf0]  ;;  %v3253_v28 = vor.u32 %v3956_v26, %v3252_v22  ;;  %v3480_v56 = vld [vmem:[#allocation11 + $0x1e8] sm:$0xf] }
 0x184   :  { %1900 = vmatpush.bf16.msrb.mxu0 %v3497_v6  ;;  %1926 = vmatpush.bf16.msrb.mxu2 %v3405_v36  ;;  %v3353_v4 = vor.u32 %v3982_v2, %v3352_v1  ;;  %v3981_v6 = vld [vmem:[#allocation11 + $0xf4] sm:$0xf]  ;;  %v3510_v36 = vld [vmem:[#allocation11 + $0x234] sm:$0xf0]  ;;  %v3288_v1 = vld [vmem:[#allocation11 + $0x68] sm:$0xf] }
 0x185   :  { %v3357_v8 = vor.u32 %v3981_v6, %v3354_v37  ;;  %v3289_v6 = vor.u32 %v3965_v3, %v3288_v1  ;;  %v4010_v1 = vld [vmem:[#allocation11 + $0x1d8] sm:$0xf0]  ;;  %v4045_v3 = vld [vmem:[#allocation13 + $0xb0] sm:$0xf0]  ;;  %v4044_v26 = vld [vmem:[#allocation13 + $0xac] sm:$0xf] }
 0x186   :  { %1891 = vmatpush.bf16.msra.mxu3 %v3353_v4  ;;  %v3336_v4 = vld [vmem:[#allocation11 + $0xc8] sm:$0xf] }
 0x187   :  { %1914 = vmatpush.bf16.msrb.mxu1 %v3297_v38  ;;  %v4459_v0 = vpop.f32.mrf.mxu3  ;;  %v3340_v38 = vld [vmem:[#allocation11 + $0xd8] sm:$0xf]  ;;  %v3337_v37 = vor.u32 %v3977_v5, %v3336_v4 }
 0x188   :  { %1901 = vmatpush.bf16.msrb.mxu0 %v3485_v14  ;;  %1927 = vmatpush.bf16.msrb.mxu2 %v3393_v44  ;;  %v3341_v14 = vor.u32 %v3979_v12, %v3340_v38  ;;  %v3325_v44 = vor.u32 %v3974_v41, %v3324_v39  ;;  %v4464_v38 = vld [vmem:[%s4492_s5] sm:$0x7] }
 0x189   :  { %v1372_v55 = vperm.slane %v4464_v38, 2 }
 0x18a   :  { %1892 = vmatpush.bf16.msra.mxu3 %v3341_v14  ;;  %v3450_v14 = vld [vmem:[#allocation11 + $0x1bc] sm:$0xf0] }
 0x18b   :  { %1915 = vmatpush.bf16.msrb.mxu1 %v3285_v20  ;;  %v3345_v20 = vor.u32 %v3978_v16, %v3342_v17  ;;  %v3453_v16 = vor.u32 %v4005_v13, %v3450_v14  ;;  %v3959_v17 = vld [vmem:[#allocation11 + $0x40] sm:$0xf0]  ;;  %v4042_v13 = vld [vmem:[#allocation13 + $0x98] sm:$0xf0] }
 0x18c   :  { %1902 = vmatpush.bf16.msrb.mxu0 %v3473_v25  ;;  %1928 = vmatpush.bf16.msrb.mxu2 %v3381_v51  ;;  %v3976_v25 = vld [vmem:[#allocation11 + $0xc8] sm:$0xf0]  ;;  %v3983_v51 = vld [vmem:[#allocation11 + $0x100] sm:$0xf0] }
 0x18e   :  { %1350 = vmatmul.bf16.vlgmr.msra.gmra.mxu0 %v4434_v53  ;;  %1363 = vmatmul.bf16.vlgmr.msra.gmra.mxu1 %v4434_v53  ;;  %v3237_v53 = vor.u32 %v3951_v45, %v3234_v46  ;;  %v4017_v46 = vld [vmem:[#allocation11 + $0x214] sm:$0xf] }
 0x18f   :  { %1916 = vmatpush.bf16.msrb.mxu1 %v3273_v27  ;;  %v1340_v18 = vpop.f32.mrf.mxu3  ;;  %v3329_v27 = vor.u32 %v3976_v25, %v3328_v24  ;;  %v3501_v49 = vor.u32 %v4017_v46, %v3498_v47  ;;  %v3504_v46 = vld [vmem:[#allocation11 + $0x218] sm:$0xf] }
 0x190   :  { %1903 = vmatpush.bf16.msrb.mxu0 %v3461_v59  ;;  %1929 = vmatpush.bf16.msrb.mxu2 %v3369_v60  ;;  %v3301_v59 = vor.u32 %v3968_v58, %v3300_v31  ;;  %v3980_v60 = vld [vmem:[#allocation11 + $0xe8] sm:$0xf0]  ;;  %v3265_v18 = vor.u32 %v3959_v17, %v3264_v15  ;;  %v4013_v31 = vld [vmem:[#allocation11 + $0x1f0] sm:$0xf0]  ;;  %v3444_v15 = vld [vmem:[#allocation11 + $0x1a0] sm:$0xf] }
 0x191   :  { %1893 = vmatpush.bf16.msra.mxu3 %v3329_v27  ;;  %v3349_v61 = vor.u32 %v3980_v60, %v3348_v34  ;;  %v3481_v60 = vor.u32 %v4013_v31, %v3480_v56  ;;  %v4004_v17 = vld [vmem:[#allocation11 + $0x1a8] sm:$0xf0]  ;;  %v4093_v56 = vld [vmem:[#allocation13 + $0x230] sm:$0xf0]  ;;  %v3520_v31 = vld [vmem:[#allocation13] sm:$0xf] }
 0x193   :  { %1917 = vmatpush.bf16.msrb.mxu1 %v3261_v35  ;;  %v4020_v35 = vld [vmem:[#allocation11 + $0x22c] sm:$0xf] }
 0x194   :  { %1904 = vmatpush.bf16.msrb.mxu0 %v3449_v7  ;;  %1930 = vmatpush.bf16.msrb.mxu2 %v3357_v8  ;;  %v3513_v40 = vor.u32 %v4020_v35, %v3510_v36  ;;  %v4008_v7 = vld [vmem:[#allocation11 + $0x1cc] sm:$0xf]  ;;  %v3462_v8 = vld [vmem:[#allocation11 + $0x1d4] sm:$0xf0]  ;;  %v3426_v35 = vld [vmem:[#allocation11 + $0x18c] sm:$0xf0] }
 0x195   :  { %v3465_v10 = vor.u32 %v4008_v7, %v3462_v8  ;;  %v3240_v36 = vld [vmem:[#allocation11 + $0x8] sm:$0xf]  ;;  %v3456_v8 = vld [vmem:[#allocation11 + $0x1b8] sm:$0xf] }
 0x196   :  { %1938 = vmatpush.bf16.msrb.mxu3 %v3513_v40  ;;  %v3953_v40 = vld [vmem:[#allocation11 + $0x10] sm:$0xf0] }
 0x197   :  { %1918 = vmatpush.bf16.msrb.mxu1 %v3249_v43  ;;  %v3986_v43 = vld [vmem:[#allocation11 + $0x118] sm:$0xf0] }
 0x198   :  { %1905 = vmatpush.bf16.msrb.mxu0 %v3437_v19  ;;  %1931 = vmatpush.bf16.msrb.mxu2 %v3345_v20  ;;  %v3373_v45 = vor.u32 %v3986_v43, %v3372_v42  ;;  %v1370_v19 = vperm.slane %v4464_v38, 0  ;;  %v4002_v20 = vld [vmem:[#allocation11 + $0x19c] sm:$0xf]  ;;  %v3517_v42 = vor.u32 %v4022_v30, %v3516_v29  ;;  %v3241_v43 = vor.u32 %v3953_v40, %v3240_v36  ;;  %v3594_v36 = vld [vmem:[#allocation13 + $0x9c] sm:$0xf0] }
 0x199   :  { %v3441_v25 = vor.u32 %v4002_v20, %v3438_v21  ;;  %v3445_v20 = vor.u32 %v4004_v17, %v3444_v15  ;;  %v3432_v21 = vld [vmem:[#allocation11 + $0x188] sm:$0xf]  ;;  %v4026_v17 = vld [vmem:[#allocation13 + $0x1c] sm:$0xf] }
 0x19a   :  { %1939 = vmatpush.bf16.msrb.mxu3 %v3501_v49 }
 0x19b   :  { %1919 = vmatpush.bf16.msrb.mxu1 %v3237_v53  ;;  %v3360_v53 = vld [vmem:[#allocation11 + $0xf8] sm:$0xf] }
 0x19c   :  { %1906 = vmatpush.bf16.msrb.mxu0 %v3425_v32  ;;  %1932 = vmatpush.bf16.msrb.mxu2 %v3333_v33  ;;  %v3361_v54 = vor.u32 %v3983_v51, %v3360_v53  ;;  %v3999_v33 = vld [vmem:[#allocation11 + $0x184] sm:$0xf]  ;;  %v4016_v53 = vld [vmem:[#allocation11 + $0x208] sm:$0xf0] }
 0x19d   :  { %v3429_v39 = vor.u32 %v3999_v33, %v3426_v35  ;;  %v4033_v33 = vld [vmem:[#allocation13 + $0x50] sm:$0xf0] }
 0x19e   :  { %1940 = vmatpush.bf16.msrb.mxu3 %v3489_v57  ;;  %v4041_v35 = vld [vmem:[#allocation13 + $0x94] sm:$0xf] }
 0x19f   :  { %1964 = vmatpush.bf16.msra.mxu1 %v3421_v52  ;;  %v3313_v52 = vor.u32 %v3971_v50, %v3312_v48  ;;  %v3492_v50 = vld [vmem:[#allocation11 + $0x200] sm:$0xf]  ;;  %v3597_v40 = vor.u32 %v4041_v35, %v3594_v36  ;;  %v3666_v36 = vld [vmem:[#allocation13 + $0x12c] sm:$0xf0] }
 0x1a0   :  { %1951 = vmatpush.bf16.msra.mxu0 %v3325_v44  ;;  %v3493_v51 = vor.u32 %v4016_v53, %v3492_v50  ;;  %v3570_v50 = vld [vmem:[#allocation13 + $0x6c] sm:$0xf0] }
 0x1a3   :  { %1965 = vmatpush.bf16.msra.mxu1 %v3409_v63  ;;  %v3474_v63 = vld [vmem:[#allocation11 + $0x1ec] sm:$0xf0] }
 0x1a4   :  { %1952 = vmatpush.bf16.msra.mxu0 %v3313_v52  ;;  %v3477_v2 = vor.u32 %v4011_v62, %v3474_v63  ;;  %v3468_v63 = vld [vmem:[#allocation11 + $0x1d0] sm:$0xf] }
 0x1a5   :  { %v3469_v7 = vor.u32 %v4010_v1, %v3468_v63  ;;  %v3702_v63 = vld [vmem:[#allocation13 + $0x174] sm:$0xf0]  ;;  %v3688_v1 = vld [vmem:[#allocation13 + $0x150] sm:$0xf] }
 0x1a6   :  { %1941 = vmatpush.bf16.msrb.mxu3 %v3477_v2  ;;  %v3604_v2 = vld [vmem:[#allocation13 + $0xa8] sm:$0xf] }
 0x1a7   :  { %1966 = vmatpush.bf16.msra.mxu1 %v3397_v11  ;;  %v3962_v11 = vld [vmem:[#allocation11 + $0x58] sm:$0xf0] }
 0x1a8   :  { %1953 = vmatpush.bf16.msra.mxu0 %v3301_v59  ;;  %v3277_v12 = vor.u32 %v3962_v11, %v3276_v9  ;;  %v3605_v9 = vor.u32 %v4045_v3, %v3604_v2  ;;  %v4066_v2 = vld [vmem:[#allocation13 + $0x158] sm:$0xf0] }
 0x1aa   :  { %1942 = vmatpush.bf16.msrb.mxu3 %v3465_v10 }
 0x1ab   :  { %1967 = vmatpush.bf16.msra.mxu1 %v3385_v23 }
 0x1ac   :  { %1954 = vmatpush.bf16.msra.mxu0 %v3289_v6 }
 0x1ae   :  { %1943 = vmatpush.bf16.msrb.mxu3 %v3453_v16 }
 0x1af   :  { %1968 = vmatpush.bf16.msra.mxu1 %v3373_v45 }
 0x1b0   :  { %1955 = vmatpush.bf16.msra.mxu0 %v3277_v12  ;;  %v3592_v12 = vld [vmem:[#allocation13 + $0x90] sm:$0xf] }
 0x1b1   :  { %v3593_v16 = vor.u32 %v4042_v13, %v3592_v12  ;;  %v3676_v12 = vld [vmem:[#allocation13 + $0x138] sm:$0xf]  ;;  %v4063_v13 = vld [vmem:[#allocation13 + $0x140] sm:$0xf0] }
 0x1b2   :  { %1944 = vmatpush.bf16.msrb.mxu3 %v3441_v25  ;;  %v4036_v25 = vld [vmem:[#allocation13 + $0x68] sm:$0xf0]  ;;  %v3677_v15 = vor.u32 %v4063_v13, %v3676_v12  ;;  %v3712_v13 = vld [vmem:[#allocation13 + $0x180] sm:$0xf] }
 0x1b3   :  { %1969 = vmatpush.bf16.msra.mxu1 %v3361_v54  ;;  %v1371_v54 = vperm.slane %v4464_v38, 1  ;;  %v4007_v38 = vld [vmem:[#allocation11 + $0x1c0] sm:$0xf0]  ;;  %v4048_v12 = vld [vmem:[#allocation13 + $0xc8] sm:$0xf0] }
 0x1b4   :  { %1956 = vmatpush.bf16.msra.mxu0 %v3265_v18  ;;  %v3457_v14 = vor.u32 %v4007_v38, %v3456_v8  ;;  %v3580_v18 = vld [vmem:[#allocation13 + $0x78] sm:$0xf]  ;;  %v3546_v8 = vld [vmem:[#allocation13 + $0x3c] sm:$0xf0] }
 0x1b6   :  { %1945 = vmatpush.bf16.msrb.mxu3 %v3429_v39 }
 0x1b7   :  { %1970 = vmatpush.bf16.msra.mxu1 %v3349_v61 }
 0x1b8   :  { %1957 = vmatpush.bf16.msra.mxu0 %v3253_v28 }
 0x1bb   :  { %1971 = vmatpush.bf16.msra.mxu1 %v3337_v37 }
 0x1bc   :  { %1958 = vmatpush.bf16.msra.mxu0 %v3241_v43  ;;  %v4038_v43 = vld [vmem:[#allocation13 + $0x7c] sm:$0xf] }
 0x1fb   :  { %v1171_v23 = vpop.f32.mrf.mxu0  ;;  %v1184_v24 = vpop.f32.mrf.mxu1 }
 0x1fc   :  { %v1339_v27 = vadd.f32 %v4459_v0, %v1171_v23  ;;  %v4019_v0 = vld [vmem:[#allocation11 + $0x220] sm:$0xf0]  ;;  %v4001_v23 = vld [vmem:[#allocation11 + $0x190] sm:$0xf0] }
 0x1fd   :  { %v3505_v49 = vor.u32 %v4019_v0, %v3504_v46  ;;  %v3433_v28 = vor.u32 %v4001_v23, %v3432_v21  ;;  %v4062_v21 = vld [vmem:[#allocation13 + $0x13c] sm:$0xf]  ;;  %v3664_v23 = vld [vmem:[#allocation13 + $0x120] sm:$0xf] }
 0x1fe   :  { %v1376_v32 = vadd.f32 %v1370_v19, %v1339_v27  ;;  %v4039_v19 = vld [vmem:[#allocation13 + $0x80] sm:$0xf0]  ;;  %v3606_v27 = vld [vmem:[#allocation13 + $0xb4] sm:$0xf0] }
 0x1ff   :  { %v3581_v22 = vor.u32 %v4039_v19, %v3580_v18  ;;  %v3609_v30 = vor.u32 %v4044_v26, %v3606_v27  ;;  %v3534_v18 = vld [vmem:[#allocation13 + $0x24] sm:$0xf0]  ;;  %v3760_v26 = vld [vmem:[#allocation13 + $0x1e0] sm:$0xf]  ;;  %v4084_v27 = vld [vmem:[#allocation13 + $0x1e8] sm:$0xf0] }
 0x200   :  { %v1379_v41 = vmax.f32 %v1376_v32, 0.0  ;;  %v3556_v32 = vld [vmem:[#allocation13 + $0x48] sm:$0xf] }
 0x201   :  { %v3557_v39 = vor.u32 %v4033_v33, %v3556_v32  ;;  %v3522_v32 = vld [vmem:[#allocation13 + $0xc] sm:$0xf0]  ;;  %v4059_v33 = vld [vmem:[#allocation13 + $0x124] sm:$0xf] }
 0x202   :  { %v4468_v44 = vpack.c.bf16 %v1379_v41, %v1379_v41  ;;  %v1197_v45 = vpop.f32.mrf.mxu2  ;;  %v3544_v41 = vld [vmem:[#allocation13 + $0x30] sm:$0xf] }
 0x203   :  { %v1173_v47 = vpop.f32.mrf.mxu0  ;;  %v1186_v48 = vpop.f32.mrf.mxu1 }
 0x204   :  { %1881 = vmatmul.bf16.vlgmr.msra.gmra.mxu2 %v4468_v44  ;;  %1920 = vmatmul.bf16.vlgmr.msrb.gmra.mxu1 %v4468_v44  ;;  %v3532_v47 = vld [vmem:[#allocation13 + $0x18] sm:$0xf]  ;;  %v4027_v48 = vld [vmem:[#allocation13 + $0x20] sm:$0xf0] }
 0x205   :  { %1977 = vmatpush.bf16.msra.mxu2 %v3517_v42  ;;  %v4030_v42 = vld [vmem:[#allocation13 + $0x38] sm:$0xf0]  ;;  %v3533_v53 = vor.u32 %v4027_v48, %v3532_v47  ;;  %v4081_v47 = vld [vmem:[#allocation13 + $0x1d0] sm:$0xf0] }
 0x206   :  { %v3545_v46 = vor.u32 %v4030_v42, %v3544_v41  ;;  %v3669_v41 = vor.u32 %v4059_v33, %v3666_v36  ;;  %v3600_v33 = vld [vmem:[#allocation13 + $0x98] sm:$0xf]  ;;  %v4043_v36 = vld [vmem:[#allocation13 + $0xa0] sm:$0xf0] }
 0x209   :  { %1978 = vmatpush.bf16.msra.mxu2 %v3505_v49  ;;  %v4035_v49 = vld [vmem:[#allocation13 + $0x64] sm:$0xf] }
 0x20a   :  { %v1199_v52 = vpop.f32.mrf.mxu2 }
 0x20b   :  { %v1351_v57 = vpop.f32.mrf.mxu0  ;;  %v1364_v58 = vpop.f32.mrf.mxu1  ;;  %v3700_v52 = vld [vmem:[#allocation13 + $0x168] sm:$0xf] }
 0x20c   :  { %v1352_v34 = vadd.f32 %v1351_v57, %v1184_v24  ;;  %v1365_v59 = vadd.f32 %v1364_v58, %v1197_v45  ;;  %v3568_v24 = vld [vmem:[#allocation13 + $0x60] sm:$0xf]  ;;  %v3582_v45 = vld [vmem:[#allocation13 + $0x84] sm:$0xf0]  ;;  %v4024_v57 = vld [vmem:[#allocation13 + $0x8] sm:$0xf0] }
 0x20d   :  { %1979 = vmatpush.bf16.msra.mxu2 %v3493_v51  ;;  %v3569_v29 = vor.u32 %v4036_v25, %v3568_v24  ;;  %v3585_v0 = vor.u32 %v4038_v43, %v3582_v45  ;;  %v3573_v51 = vor.u32 %v4035_v49, %v3570_v50  ;;  %v4060_v25 = vld [vmem:[#allocation13 + $0x128] sm:$0xf0]  ;;  %v3652_v43 = vld [vmem:[#allocation13 + $0x108] sm:$0xf]  ;;  %v4057_v45 = vld [vmem:[#allocation13 + $0x110] sm:$0xf0] }
 0x20e   :  { %v1377_v61 = vadd.f32 %v1371_v54, %v1352_v34  ;;  %v1378_v62 = vadd.f32 %v1372_v55, %v1365_v59  ;;  %v4069_v54 = vld [vmem:[#allocation13 + $0x170] sm:$0xf0]  ;;  %v3521_v34 = vor.u32 %v4024_v57, %v3520_v31  ;;  %v4032_v59 = vld [vmem:[#allocation13 + $0x4c] sm:$0xf]  ;;  %v3654_v50 = vld [vmem:[#allocation13 + $0x114] sm:$0xf0] }
 0x20f   :  { %v3701_v55 = vor.u32 %v4069_v54, %v3700_v52  ;;  %v4056_v49 = vld [vmem:[#allocation13 + $0x10c] sm:$0xf]  ;;  %v4067_v52 = vld [vmem:[#allocation13 + $0x160] sm:$0xf0]  ;;  %v3640_v54 = vld [vmem:[#allocation13 + $0xf0] sm:$0xf] }
 0x210   :  { %v1380_v4 = vmax.f32 %v1377_v61, 0.0  ;;  %v1381_v5 = vmax.f32 %v1378_v62, 0.0  ;;  %v4068_v61 = vld [vmem:[#allocation13 + $0x16c] sm:$0xf]  ;;  %v3736_v31 = vld [vmem:[#allocation13 + $0x1b0] sm:$0xf] }
 0x211   :  { %1980 = vmatpush.bf16.msra.mxu2 %v3481_v60  ;;  %v3558_v60 = vld [vmem:[#allocation13 + $0x54] sm:$0xf0]  ;;  %v3705_v3 = vor.u32 %v4068_v61, %v3702_v63  ;;  %v4078_v57 = vld [vmem:[#allocation13 + $0x1b8] sm:$0xf0]  ;;  %v3684_v61 = vld [vmem:[#allocation13 + $0x140] sm:$0xf] }
 0x212   :  { %v1383_v6 = vpack.c.bf16 %v1380_v4, %v1380_v4  ;;  %v1384_v37 = vpack.c.bf16 %v1381_v5, %v1381_v5  ;;  %v3561_v62 = vor.u32 %v4032_v59, %v3558_v60  ;;  %v3689_v4 = vor.u32 %v4066_v2, %v3688_v1  ;;  %v3784_v5 = vld [vmem:[#allocation13 + $0x210] sm:$0xf]  ;;  %v3642_v59 = vld [vmem:[#allocation13 + $0xfc] sm:$0xf0]  ;;  %v3628_v1 = vld [vmem:[#allocation13 + $0xd8] sm:$0xf] }
 0x213   :  { %v1353_v10 = vpop.f32.mrf.mxu0  ;;  %v1366_v11 = vpop.f32.mrf.mxu1  ;;  %v4051_v2 = vld [vmem:[#allocation13 + $0xe0] sm:$0xf0] }
 0x214   :  { %1894 = vmatmul.bf16.vlgmr.msra.gmra.mxu3 %v1383_v6  ;;  %1907 = vmatmul.bf16.vlgmr.msrb.gmra.mxu0 %v1384_v37  ;;  %v3690_v11 = vld [vmem:[#allocation13 + $0x15c] sm:$0xf0] }
 0x215   :  { %1933 = vmatmul.bf16.vlgmr.msrb.gmra.mxu2 %v1383_v6  ;;  %1972 = vmatmul.bf16.vlgmr.msra.gmra.mxu1 %v1383_v6  ;;  %v4090_v6 = vld [vmem:[#allocation13 + $0x218] sm:$0xf0] }
 0x216   :  { %1981 = vmatpush.bf16.msra.mxu2 %v3469_v7  ;;  %2484 = vmatpush.bf16.msra.mxu3 %v3605_v9  ;;  %v4029_v7 = vld [vmem:[#allocation13 + $0x34] sm:$0xf] }
 0x217   :  { %2497 = vmatpush.bf16.msrb.mxu0 %v3701_v55  ;;  %v4065_v9 = vld [vmem:[#allocation13 + $0x154] sm:$0xf]  ;;  %v3549_v10 = vor.u32 %v4029_v7, %v3546_v8  ;;  %v3630_v7 = vld [vmem:[#allocation13 + $0xe4] sm:$0xf0] }
 0x218   :  { %v3693_v38 = vor.u32 %v4065_v9, %v3690_v11  ;;  %v3672_v9 = vld [vmem:[#allocation13 + $0x128] sm:$0xf] }
 0x21a   :  { %1982 = vmatpush.bf16.msra.mxu2 %v3457_v14  ;;  %2485 = vmatpush.bf16.msra.mxu3 %v3593_v16  ;;  %v3772_v14 = vld [vmem:[#allocation13 + $0x1f8] sm:$0xf]  ;;  %v4087_v16 = vld [vmem:[#allocation13 + $0x200] sm:$0xf0] }
 0x21b   :  { %2498 = vmatpush.bf16.msrb.mxu0 %v3689_v4  ;;  %v3773_v19 = vor.u32 %v4087_v16, %v3772_v14  ;;  %v3629_v4 = vor.u32 %v4051_v2, %v3628_v1  ;;  %v4092_v16 = vld [vmem:[#allocation13 + $0x22c] sm:$0xf]  ;;  %v4034_v1 = vld [vmem:[#allocation13 + $0x58] sm:$0xf0] }
 0x21e   :  { %1983 = vmatpush.bf16.msra.mxu2 %v3445_v20  ;;  %2486 = vmatpush.bf16.msra.mxu3 %v3581_v22  ;;  %v3537_v20 = vor.u32 %v4026_v17, %v3534_v18  ;;  %v3678_v22 = vld [vmem:[#allocation13 + $0x144] sm:$0xf0]  ;;  %v3798_v17 = vld [vmem:[#allocation13 + $0x234] sm:$0xf0] }
 0x21f   :  { %2499 = vmatpush.bf16.msrb.mxu0 %v3677_v15  ;;  %v3681_v24 = vor.u32 %v4062_v21, %v3678_v22  ;;  %v4072_v15 = vld [vmem:[#allocation13 + $0x188] sm:$0xf0]  ;;  %v4046_v21 = vld [vmem:[#allocation13 + $0xb8] sm:$0xf0]  ;;  %v4047_v22 = vld [vmem:[#allocation13 + $0xc4] sm:$0xf] }
 0x220   :  { %v3713_v18 = vor.u32 %v4072_v15, %v3712_v13  ;;  %v3726_v13 = vld [vmem:[#allocation13 + $0x1a4] sm:$0xf0] }
 0x222   :  { %1984 = vmatpush.bf16.msra.mxu2 %v3433_v28  ;;  %2487 = vmatpush.bf16.msra.mxu3 %v3569_v29  ;;  %v3665_v28 = vor.u32 %v4060_v25, %v3664_v23  ;;  %v3761_v29 = vor.u32 %v4084_v27, %v3760_v26  ;;  %v3660_v25 = vld [vmem:[#allocation13 + $0x110] sm:$0xf]  ;;  %v4058_v26 = vld [vmem:[#allocation13 + $0x118] sm:$0xf0] }
 0x224   :  { %1946 = vmatmul.bf16.vlgmr.msrb.gmra.mxu3 %v1384_v37  ;;  %1959 = vmatmul.bf16.vlgmr.msra.gmra.mxu0 %v4468_v44  ;;  %v3796_v44 = vld [vmem:[#allocation13 + $0x228] sm:$0xf] }
 0x225   :  { %1985 = vmatmul.bf16.vlgmr.msra.gmra.mxu2 %v1384_v37  ;;  %v3797_v58 = vor.u32 %v4093_v56, %v3796_v44  ;;  %v3785_v37 = vor.u32 %v4090_v6, %v3784_v5  ;;  %2500 = vmatpush.bf16.msrb.mxu0 %v3665_v28  ;;  %v4054_v44 = vld [vmem:[#allocation13 + $0xf8] sm:$0xf0]  ;;  %v4075_v5 = vld [vmem:[#allocation13 + $0x1a0] sm:$0xf0]  ;;  %v3661_v28 = vor.u32 %v4058_v26, %v3660_v25  ;;  %v3528_v25 = vld [vmem:[#allocation13 + $0x8] sm:$0xf] }
 0x226   :  { %2523 = vmatpush.bf16.msrb.mxu2 %v3609_v30  ;;  %2488 = vmatpush.bf16.msra.mxu3 %v3557_v39  ;;  %v4023_v30 = vld [vmem:[#allocation13 + $0x4] sm:$0xf]  ;;  %v3708_v39 = vld [vmem:[#allocation13 + $0x170] sm:$0xf]  ;;  %v3641_v56 = vor.u32 %v4054_v44, %v3640_v54 }
 0x227   :  { %2510 = vmatpush.bf16.msrb.mxu1 %v3797_v58  ;;  %v3525_v35 = vor.u32 %v4023_v30, %v3522_v32  ;;  %v3737_v58 = vor.u32 %v4078_v57, %v3736_v31  ;;  %v4089_v30 = vld [vmem:[#allocation13 + $0x214] sm:$0xf]  ;;  %v3786_v32 = vld [vmem:[#allocation13 + $0x21c] sm:$0xf0]  ;;  %v4083_v54 = vld [vmem:[#allocation13 + $0x1e4] sm:$0xf] }
 0x228   :  { %v3762_v44 = vld [vmem:[#allocation13 + $0x1ec] sm:$0xf0]  ;;  %v4037_v31 = vld [vmem:[#allocation13 + $0x70] sm:$0xf0] }
 0x22a   :  { %2524 = vmatpush.bf16.msrb.mxu2 %v3597_v40  ;;  %2489 = vmatpush.bf16.msra.mxu3 %v3545_v46  ;;  %v4070_v40 = vld [vmem:[#allocation13 + $0x178] sm:$0xf0]  ;;  %v3748_v46 = vld [vmem:[#allocation13 + $0x1c8] sm:$0xf] }
 0x22b   :  { %2511 = vmatpush.bf16.msrb.mxu1 %v3785_v37  ;;  %v3709_v42 = vor.u32 %v4070_v40, %v3708_v39  ;;  %v3749_v48 = vor.u32 %v4081_v47, %v3748_v46  ;;  %v4050_v37 = vld [vmem:[#allocation13 + $0xdc] sm:$0xf]  ;;  %v3648_v39 = vld [vmem:[#allocation13 + $0xf8] sm:$0xf]  ;;  %v4055_v40 = vld [vmem:[#allocation13 + $0x100] sm:$0xf0] }
 0x22c   :  { %v3633_v8 = vor.u32 %v4050_v37, %v3630_v7  ;;  %v3588_v46 = vld [vmem:[#allocation13 + $0x80] sm:$0xf]  ;;  %v4040_v47 = vld [vmem:[#allocation13 + $0x88] sm:$0xf0]  ;;  %v3552_v7 = vld [vmem:[#allocation13 + $0x38] sm:$0xf] }
 0x22d   :  { %v3738_v37 = vld [vmem:[#allocation13 + $0x1bc] sm:$0xf0] }
 0x22e   :  { %2525 = vmatpush.bf16.msrb.mxu2 %v3585_v0  ;;  %2490 = vmatpush.bf16.msra.mxu3 %v3533_v53  ;;  %v3653_v0 = vor.u32 %v4057_v45, %v3652_v43  ;;  %v3696_v53 = vld [vmem:[#allocation13 + $0x158] sm:$0xf]  ;;  %v4086_v43 = vld [vmem:[#allocation13 + $0x1fc] sm:$0xf]  ;;  %v3774_v45 = vld [vmem:[#allocation13 + $0x204] sm:$0xf0] }
 0x22f   :  { %2512 = vmatpush.bf16.msrb.mxu1 %v3773_v19  ;;  %v3697_v55 = vor.u32 %v4067_v52, %v3696_v53  ;;  %v3801_v19 = vor.u32 %v4092_v16, %v3798_v17  ;;  %v4052_v53 = vld [vmem:[#allocation13 + $0xe8] sm:$0xf0] }
 0x230   :  { %2501 = vmatpush.bf16.msrb.mxu0 %v3653_v0  ;;  %v3777_v0 = vor.u32 %v4086_v43, %v3774_v45  ;;  %v4028_v17 = vld [vmem:[#allocation13 + $0x28] sm:$0xf0] }
 0x232   :  { %2526 = vmatpush.bf16.msrb.mxu2 %v3573_v51  ;;  %2491 = vmatpush.bf16.msra.mxu3 %v3521_v34  ;;  %v3657_v51 = vor.u32 %v4056_v49, %v3654_v50  ;;  %v4053_v34 = vld [vmem:[#allocation13 + $0xf4] sm:$0xf]  ;;  %v3589_v49 = vor.u32 %v4040_v47, %v3588_v46  ;;  %v3636_v50 = vld [vmem:[#allocation13 + $0xe0] sm:$0xf] }
 0x233   :  { %2513 = vmatpush.bf16.msrb.mxu1 %v3761_v29  ;;  %v3645_v60 = vor.u32 %v4053_v34, %v3642_v59  ;;  %v4049_v34 = vld [vmem:[#allocation13 + $0xd0] sm:$0xf0] }
 0x234   :  { %2502 = vmatpush.bf16.msrb.mxu0 %v3641_v56  ;;  %v3765_v56 = vor.u32 %v4083_v54, %v3762_v44  ;;  %v3768_v44 = vld [vmem:[#allocation13 + $0x1e8] sm:$0xf] }
 0x236   :  { %2527 = vmatpush.bf16.msrb.mxu2 %v3561_v62  ;;  %2536 = vmatpush.bf16.msrb.mxu3 %v3705_v3  ;;  %v4064_v62 = vld [vmem:[#allocation13 + $0x148] sm:$0xf0]  ;;  %v3724_v3 = vld [vmem:[#allocation13 + $0x198] sm:$0xf] }
 0x237   :  { %2514 = vmatpush.bf16.msrb.mxu1 %v3749_v48  ;;  %v3685_v63 = vor.u32 %v4064_v62, %v3684_v61  ;;  %v3725_v6 = vor.u32 %v4075_v5, %v3724_v3  ;;  %v3750_v61 = vld [vmem:[#allocation13 + $0x1d4] sm:$0xf0]  ;;  %v3564_v62 = vld [vmem:[#allocation13 + $0x50] sm:$0xf] }
 0x238   :  { %2503 = vmatpush.bf16.msrb.mxu0 %v3629_v4  ;;  %v3565_v3 = vor.u32 %v4034_v1, %v3564_v62  ;;  %v1481_v4 = vld [vmem:[%s4494_s7] sm:$0x7]  ;;  %v3756_v62 = vld [vmem:[#allocation13 + $0x1d0] sm:$0xf] }
 0x239   :  { %v1485_v45 = vperm.slane %v1481_v4, 2  ;;  %v1484_v46 = vperm.slane %v1481_v4, 1 }
 0x23a   :  { %2528 = vmatpush.bf16.msrb.mxu2 %v3549_v10  ;;  %2537 = vmatpush.bf16.msrb.mxu3 %v3693_v38  ;;  %v4061_v10 = vld [vmem:[#allocation13 + $0x130] sm:$0xf0]  ;;  %v3616_v38 = vld [vmem:[#allocation13 + $0xc0] sm:$0xf] }
 0x23b   :  { %2515 = vmatpush.bf16.msrb.mxu1 %v3737_v58  ;;  %v3673_v11 = vor.u32 %v4061_v10, %v3672_v9  ;;  %v3617_v14 = vor.u32 %v4048_v12, %v3616_v38  ;;  %v3624_v58 = vld [vmem:[#allocation13 + $0xc8] sm:$0xf]  ;;  %v4074_v12 = vld [vmem:[#allocation13 + $0x19c] sm:$0xf] }
 0x23c   :  { %v3625_v59 = vor.u32 %v4049_v34, %v3624_v58  ;;  %v3729_v16 = vor.u32 %v4074_v12, %v3726_v13 }
 0x23d   :  { %2504 = vmatpush.bf16.msrb.mxu0 %v3617_v14  ;;  %v3540_v14 = vld [vmem:[#allocation13 + $0x20] sm:$0xf] }
 0x23e   :  { %2529 = vmatpush.bf16.msrb.mxu2 %v3537_v20  ;;  %2538 = vmatpush.bf16.msrb.mxu3 %v3681_v24  ;;  %v3612_v20 = vld [vmem:[#allocation13 + $0xb0] sm:$0xf] }
 0x23f   :  { %2516 = vmatpush.bf16.msrb.mxu1 %v3725_v6  ;;  %v3613_v23 = vor.u32 %v4046_v21, %v3612_v20  ;;  %v3618_v24 = vld [vmem:[#allocation13 + $0xcc] sm:$0xf0]  ;;  %v4077_v6 = vld [vmem:[#allocation13 + $0x1b4] sm:$0xf] }
 0x240   :  { %v3621_v27 = vor.u32 %v4047_v22, %v3618_v24  ;;  %v3741_v10 = vor.u32 %v4077_v6, %v3738_v37  ;;  %v3714_v24 = vld [vmem:[#allocation13 + $0x18c] sm:$0xf0] }
 0x241   :  { %2549 = vmatpush.bf16.msra.mxu0 %v3801_v19  ;;  %v3541_v19 = vor.u32 %v4028_v17, %v3540_v14 }
 0x242   :  { %2530 = vmatpush.bf16.msrb.mxu2 %v3525_v35  ;;  %2539 = vmatpush.bf16.msrb.mxu3 %v3669_v41  ;;  %v3789_v35 = vor.u32 %v4089_v30, %v3786_v32  ;;  %v3601_v41 = vor.u32 %v4043_v36, %v3600_v33  ;;  %v4094_v30 = vld [vmem:[#allocation13 + $0x238] sm:$0xf0]  ;;  %v4025_v33 = vld [vmem:[#allocation13 + $0x10] sm:$0xf0] }
 0x243   :  { %2517 = vmatpush.bf16.msrb.mxu1 %v3713_v18 }
 0x245   :  { %2550 = vmatpush.bf16.msra.mxu0 %v3789_v35  ;;  %v3529_v35 = vor.u32 %v4025_v33, %v3528_v25 }
 0x246   :  { %2575 = vmatpush.bf16.msra.mxu2 %v3709_v42  ;;  %2540 = vmatpush.bf16.msrb.mxu3 %v3657_v51  ;;  %v3649_v42 = vor.u32 %v4055_v40, %v3648_v39  ;;  %v3637_v51 = vor.u32 %v4052_v53, %v3636_v50  ;;  %v4088_v50 = vld [vmem:[#allocation13 + $0x208] sm:$0xf0] }
 0x247   :  { %2562 = vmatpush.bf16.msra.mxu1 %v3613_v23  ;;  %v4071_v23 = vld [vmem:[#allocation13 + $0x184] sm:$0xf] }
 0x248   :  { %v3717_v32 = vor.u32 %v4071_v23, %v3714_v24 }
 0x249   :  { %2551 = vmatpush.bf16.msra.mxu0 %v3777_v0 }
 0x24a   :  { %2576 = vmatpush.bf16.msra.mxu2 %v3697_v55  ;;  %2541 = vmatpush.bf16.msrb.mxu3 %v3645_v60  ;;  %v3576_v55 = vld [vmem:[#allocation13 + $0x68] sm:$0xf]  ;;  %v4080_v60 = vld [vmem:[#allocation13 + $0x1cc] sm:$0xf] }
 0x24b   :  { %2563 = vmatpush.bf16.msra.mxu1 %v3601_v41  ;;  %v3577_v57 = vor.u32 %v4037_v31, %v3576_v55  ;;  %v3792_v41 = vld [vmem:[#allocation13 + $0x218] sm:$0xf]  ;;  %v4085_v55 = vld [vmem:[#allocation13 + $0x1f0] sm:$0xf0] }
 0x24d   :  { %2552 = vmatpush.bf16.msra.mxu0 %v3765_v56 }
 0x24e   :  { %2577 = vmatpush.bf16.msra.mxu2 %v3685_v63  ;;  %2542 = vmatpush.bf16.msrb.mxu3 %v3633_v8  ;;  %v3753_v63 = vor.u32 %v4080_v60, %v3750_v61  ;;  %v1483_v8 = vperm.slane %v1481_v4, 0  ;;  %v3769_v60 = vor.u32 %v4085_v55, %v3768_v44  ;;  %v3744_v4 = vld [vmem:[#allocation13 + $0x1b8] sm:$0xf] }
 0x24f   :  { %2564 = vmatpush.bf16.msra.mxu1 %v3589_v49  ;;  %v3780_v49 = vld [vmem:[#allocation13 + $0x200] sm:$0xf] }
 0x251   :  { %2553 = vmatpush.bf16.msra.mxu0 %v3753_v63  ;;  %v4082_v63 = vld [vmem:[#allocation13 + $0x1d8] sm:$0xf0] }
 0x252   :  { %2578 = vmatpush.bf16.msra.mxu2 %v3673_v11  ;;  %2543 = vmatpush.bf16.msrb.mxu3 %v3621_v27  ;;  %v4031_v11 = vld [vmem:[#allocation13 + $0x40] sm:$0xf0] }
 0x253   :  { %2565 = vmatpush.bf16.msra.mxu1 %v3577_v57  ;;  %v3553_v38 = vor.u32 %v4031_v11, %v3552_v7  ;;  %v3720_v11 = vld [vmem:[#allocation13 + $0x188] sm:$0xf] }
 0x255   :  { %2554 = vmatpush.bf16.msra.mxu0 %v3741_v10 }
 0x256   :  { %2579 = vmatpush.bf16.msra.mxu2 %v3661_v28  ;;  %v3804_v28 = vld [vmem:[#allocation13 + $0x230] sm:$0xf] }
 0x257   :  { %2566 = vmatpush.bf16.msra.mxu1 %v3565_v3  ;;  %v3805_v39 = vor.u32 %v4094_v30, %v3804_v28 }
 0x259   :  { %2555 = vmatpush.bf16.msra.mxu0 %v3729_v16 }
 0x25a   :  { %2580 = vmatpush.bf16.msra.mxu2 %v3649_v42  ;;  %v4091_v42 = vld [vmem:[#allocation13 + $0x220] sm:$0xf0] }
 0x25b   :  { %2567 = vmatpush.bf16.msra.mxu1 %v3553_v38  ;;  %v4073_v38 = vld [vmem:[#allocation13 + $0x190] sm:$0xf0] }
 0x25c   :  { %v3721_v12 = vor.u32 %v4073_v38, %v3720_v11 }
 0x25d   :  { %2556 = vmatpush.bf16.msra.mxu0 %v3717_v32 }
 0x25e   :  { %2581 = vmatpush.bf16.msra.mxu2 %v3637_v51 }
 0x25f   :  { %2568 = vmatpush.bf16.msra.mxu1 %v3541_v19  ;;  %v2092_v19 = vld [vmem:[%s4496_s9] sm:$0x7] }
 0x260   :  { %v2095_v23 = vperm.slane %v2092_v19, 1  ;;  %v2096_v32 = vperm.slane %v2092_v19, 2 }
 0x262   :  { %2582 = vmatpush.bf16.msra.mxu2 %v3625_v59 }
 0x263   :  { %2569 = vmatpush.bf16.msra.mxu1 %v3529_v35 }
 0x281   :  { %v4475_v29 = vpop.f32.mrf.mxu1 }
 0x282   :  { %v1922_v51 = vadd.f32 %v4475_v29, %v1484_v46  ;;  %v3757_v29 = vor.u32 %v4082_v63, %v3756_v62 }
 0x287   :  { %v1882_v48 = vpop.f32.mrf.mxu2 }
 0x288   :  { %v1883_v15 = vadd.f32 %v1882_v48, %v1483_v8  ;;  %v3793_v48 = vor.u32 %v4091_v42, %v3792_v41  ;;  %v3732_v8 = vld [vmem:[#allocation13 + $0x1a0] sm:$0xf] }
 0x289   :  { %v1923_v52 = vpop.f32.mrf.mxu1 }
 0x28a   :  { %v3781_v52 = vor.u32 %v4088_v50, %v3780_v49 }
 0x28f   :  { %v1884_v2 = vpop.f32.mrf.mxu2 }
 0x291   :  { %v1908_v5 = vpop.f32.mrf.mxu0 }
 0x292   :  { %v1973_v9 = vpop.f32.mrf.mxu1 }
 0x297   :  { %v1895_v18 = vpop.f32.mrf.mxu3 }
 0x298   :  { %v1896_v20 = vadd.f32 %v1895_v18, %v1883_v15  ;;  %v1934_v21 = vpop.f32.mrf.mxu2 }
 0x299   :  { %v1910_v22 = vpop.f32.mrf.mxu0  ;;  %v1935_v54 = vadd.f32 %v1934_v21, %v1922_v51 }
 0x29a   :  { %v1909_v26 = vadd.f32 %v1908_v5, %v1896_v20  ;;  %v1975_v27 = vpop.f32.mrf.mxu1  ;;  %v4079_v5 = vld [vmem:[#allocation13 + $0x1c0] sm:$0xf0]  ;;  %v2094_v22 = vperm.slane %v2092_v19, 0 }
 0x29b   :  { %v3745_v7 = vor.u32 %v4079_v5, %v3744_v4 }
 0x29c   :  { %v1990_v36 = vmax.f32 %v1909_v26, 0.0 }
 0x29e   :  { %v1993_v40 = vpack.c.bf16 %v1990_v36, %v1990_v36 }
 0x29f   :  { %v1897_v43 = vpop.f32.mrf.mxu3 }
 0x2a0   :  { %v1936_v0 = vpop.f32.mrf.mxu2  ;;  %2492 = vmatmul.bf16.vlgmr.msra.gmra.mxu3 %v1993_v40  ;;  %2531 = vmatmul.bf16.vlgmr.msrb.gmra.mxu2 %v1993_v40  ;;  %v2604_v43 = vld [vmem:[#allocation14] sm:$0x7] }
 0x2a1   :  { %v1960_v47 = vpop.f32.mrf.mxu0  ;;  %2588 = vmatpush.bf16.msra.mxu3 %v3805_v39  ;;  %v2607_v46 = vperm.slane %v2604_v43, 1 }
 0x2a2   :  { %v1961_v53 = vadd.f32 %v1960_v47, %v1485_v45  ;;  %v2606_v47 = vperm.slane %v2604_v43, 0 }
 0x2a4   :  { %v1974_v31 = vadd.f32 %v1973_v9, %v1961_v53  ;;  %v4076_v9 = vld [vmem:[#allocation13 + $0x1a8] sm:$0xf0] }
 0x2a5   :  { %2589 = vmatpush.bf16.msra.mxu3 %v3793_v48  ;;  %v3733_v10 = vor.u32 %v4076_v9, %v3732_v8 }
 0x2a7   :  { %v1947_v56 = vpop.f32.mrf.mxu3 }
 0x2a8   :  { %v1948_v57 = vadd.f32 %v1947_v56, %v1935_v54  ;;  %v1986_v58 = vpop.f32.mrf.mxu2  ;;  %v2608_v54 = vperm.slane %v2604_v43, 2 }
 0x2a9   :  { %v1987_v34 = vadd.f32 %v1986_v58, %v1974_v31  ;;  %v1962_v59 = vpop.f32.mrf.mxu0  ;;  %2590 = vmatpush.bf16.msra.mxu3 %v3781_v52 }
 0x2aa   :  { %v1991_v61 = vmax.f32 %v1948_v57, 0.0 }
 0x2ab   :  { %v1992_v1 = vmax.f32 %v1987_v34, 0.0  ;;  %v4109_v34 = vld [vmem:[#allocation2] ss:$0 sm:$0xff] }
 0x2ac   :  { %v1994_v2 = vpack.c.bf16 %v1991_v61, %v1991_v61 }
 0x2ad   :  { %v1995_v3 = vpack.c.bf16 %v1992_v1, %v1992_v1  ;;  %2591 = vmatpush.bf16.msra.mxu3 %v3769_v60 }
 0x2ae   :  { %2505 = vmatmul.bf16.vlgmr.msrb.gmra.mxu0 %v1994_v2 }
 0x2af   :  { %2518 = vmatmul.bf16.vlgmr.msrb.gmra.mxu1 %v1995_v3  ;;  %v1949_v6 = vpop.f32.mrf.mxu3 }
 0x2b0   :  { %v1988_v37 = vpop.f32.mrf.mxu2  ;;  %2544 = vmatmul.bf16.vlgmr.msrb.gmra.mxu3 %v1994_v2  ;;  %2583 = vmatmul.bf16.vlgmr.msra.gmra.mxu2 %v1994_v2 }
 0x2b1   :  { %2592 = vmatpush.bf16.msra.mxu3 %v3757_v29 }
 0x2b5   :  { %2593 = vmatpush.bf16.msra.mxu3 %v3745_v7 }
 0x2b9   :  { %2594 = vmatpush.bf16.msra.mxu3 %v3733_v10 }
 0x2bd   :  { %2595 = vmatpush.bf16.msra.mxu3 %v3721_v12 }
 0x2be   :  { %2557 = vmatmul.bf16.vlgmr.msra.gmra.mxu0 %v1995_v3 }
 0x2bf   :  { %2570 = vmatmul.bf16.vlgmr.msra.gmra.mxu1 %v1993_v40 }
 0x2c0   :  { %2596 = vmatmul.bf16.vlgmr.msra.gmra.mxu3 %v1995_v3 }
 0x323   :  { %v2493_v13 = vpop.f32.mrf.mxu3  ;;  %v2532_v14 = vpop.f32.mrf.mxu2 }
 0x324   :  { %v2494_v26 = vadd.f32 %v2493_v13, %v2094_v22  ;;  %v2533_v27 = vadd.f32 %v2532_v14, %v2095_v23 }
 0x32b   :  { %v2495_v15 = vpop.f32.mrf.mxu3  ;;  %v2506_v16 = vpop.f32.mrf.mxu0 }
 0x32c   :  { %v2519_v17 = vpop.f32.mrf.mxu1  ;;  %v2534_v18 = vpop.f32.mrf.mxu2  ;;  %v2507_v28 = vadd.f32 %v2506_v16, %v2494_v26 }
 0x32e   :  { %v2520_v41 = vadd.f32 %v2519_v17, %v2507_v28 }
 0x330   :  { %v2601_v0 = vmax.f32 %v2520_v41, 0.0 }
 0x332   :  { %v2612_v44 = vmul.f32 %v2606_v47, %v2601_v0 }
 0x333   :  { %v2508_v20 = vpop.f32.mrf.mxu0  ;;  %v2545_v21 = vpop.f32.mrf.mxu3 }
 0x334   :  { %v2521_v24 = vpop.f32.mrf.mxu1  ;;  %v2584_v25 = vpop.f32.mrf.mxu2  ;;  %v2546_v30 = vadd.f32 %v2545_v21, %v2533_v27 }
 0x33b   :  { %v2547_v33 = vpop.f32.mrf.mxu3  ;;  %v2558_v35 = vpop.f32.mrf.mxu0 }
 0x33c   :  { %v2559_v36 = vadd.f32 %v2558_v35, %v2546_v30  ;;  %v2571_v39 = vpop.f32.mrf.mxu1  ;;  %v2586_v40 = vpop.f32.mrf.mxu2 }
 0x33d   :  { %v2572_v42 = vadd.f32 %v2571_v39, %v2096_v32 }
 0x33e   :  { %v2602_v45 = vmax.f32 %v2559_v36, 0.0 }
 0x33f   :  { %v2585_v48 = vadd.f32 %v2584_v25, %v2572_v42 }
 0x340   :  { %v2613_v53 = vmul.f32 %v2607_v46, %v2602_v45 }
 0x342   :  { %v2615_v31 = vadd.f32 %v2613_v53, %v2612_v44 }
 0x343   :  { %v2560_v49 = vpop.f32.mrf.mxu0  ;;  %v2597_v50 = vpop.f32.mrf.mxu3 }
 0x344   :  { %v2573_v51 = vpop.f32.mrf.mxu1  ;;  %v2598_v52 = vadd.f32 %v2597_v50, %v2585_v48 }
 0x346   :  { %v2603_v55 = vmax.f32 %v2598_v52, 0.0 }
 0x348   :  { %v2614_v56 = vmul.f32 %v2608_v54, %v2603_v55 }
 0x34a   :  { %v2616_v57 = vadd.f32 %v2615_v31, %v2614_v56 }
 0x34b   :  { %v2599_v58 = vpop.f32.mrf.mxu3 }
 0x34c   :  { %2617 = vadd.xlane.f32.xlu0 %v2616_v57 }
 0x3bf   :  { %v2618_v59 = vpop.xlane.xlu0 %2617 }
 0x3c0   :  { %v2623_v60 = vadd.f32 %v4109_v34, %v2618_v59 }
 0x3c2   :  { %v3806_v61 = vmul.f32 -1.442695, %v2623_v60 }
 0x3c4   :  { %4110 = vpow2.f32 %v3806_v61 }
 0x3ca   :  { %v4111_v62 = vpop.eup %4110 }
 0x3cb   :  { %v2627_v63 = vadd.f32 1.0, %v4111_v62 }
 0x3cd   :  { %4112 = vrcp.f32 %v2627_v63  ;;  %v2639_v29 = vand.u32 2147483648, %v2627_v63  ;;  %v2637_v5 = vand.u32 2147483647, %v2627_v63  ;;  %vm2633_vm1 = vweird.f32 %v2627_v63 }
 0x3cf   :  { %v2640_v37 = vor.u32 1.1754944e-38, %v2639_v29  ;;  %vm2638_vm4 = vcmp.eq.f32.partialorder %v2637_v5, 8.507059e+37 }
 0x3d3   :  { %v4113_v1 = vpop.eup %4112 }
 0x3d4   :  { %v2629_v2 = vmul.f32 %v4113_v1, %v2627_v63  ;;  %vm2634_vm0 = vweird.f32 %v4113_v1 }
 0x3d5   :  { %vm2635_vm2 = vmor %vm2633_vm1, %vm2634_vm0 }
 0x3d6   :  { %v2630_v3 = vsub.f32 1.0, %v2629_v2 }
 0x3d8   :  { %v2631_v4 = vmul.f32 %v4113_v1, %v2630_v3 }
 0x3da   :  { %v2632_v6 = vadd.f32 %v4113_v1, %v2631_v4 }
 0x3dc   :  { %v2636_v7 = vsel %vm2635_vm2, %v4113_v1, %v2632_v6 }
 0x3dd   :  { %v2641_v8 = vsel %vm2638_vm4, %v2640_v37, %v2636_v7 }
 0x3de   :  { %2644 = vst.msk [vmem:[%s4499_s12] sm:$0xff] %vm2643_vm3, %v2641_v8 }
 0x3df   :  { %2649 = vsyncpa [#allocation4], 1 }
 0x3e0   :  { %2650 = vsyncpa [#allocation6], 1 }
 0x3e1   :  { %2651 = vsyncpa [#allocation9], 1 }
 0x3e2   :  { %2652 = vsyncpa [#allocation12], 1 }
 0x3e3   :  { %2653 = vsyncpa [#allocation15], 1 }

</bundles_post_ra>
